<compile_context>
chip_gen: v7x
topology: tpu7x:2x2x1
jax: 0.10.0
libtpu: 0.0.40
codegen_flags: <defaults>
</compile_context>

<pallas_src>
import math
import functools

import jax
import jax.numpy as jnp
from jax.experimental import pallas as pl
from jax.experimental.pallas import tpu as pltpu

EPS_LN = 1e-6      # nn.LayerNorm eps
EPS_NORM = 1e-12   # F.normalize eps


# ----------------------------- in-kernel helpers ------------------------------------

def _layernorm(x, eps=EPS_LN):
    # LayerNorm over last dim, no affine (elementwise_affine=False).
    mu = jnp.mean(x, axis=-1, keepdims=True)
    var = jnp.mean((x - mu) ** 2, axis=-1, keepdims=True)
    return (x - mu) * jax.lax.rsqrt(var + eps)


def _rmsnorm(x, g):
    # Reference RMSNorm: F.normalize(x, dim=-1) * g * sqrt(dim)
    n = jnp.sqrt(jnp.sum(x * x, axis=-1, keepdims=True))
    n = jnp.maximum(n, EPS_NORM)
    return x / n * g * math.sqrt(x.shape[-1])


def _aligned(i, m):
    # pl.multiple_of hint only for traced offsets.
    if isinstance(i, int):
        return i
    return pl.multiple_of(i, m)


def _foreach(n, body):
    # Unroll short loops (LLO visibility), lax.fori_loop for long ones (code size).
    if n <= 4:
        for i in range(n):
            body(i)
    else:
        def _step(i, carry):
            body(i)
            return carry
        jax.lax.fori_loop(0, n, _step, 0)


def _pick_tile(n, target):
    # Largest divisor of n that is <= target, preferring sublane-aligned (multiple of 8).
    if n <= target:
        return n
    for t in range(target, 7, -1):
        if n % t == 0 and t % 8 == 0:
            return t
    for t in range(target, 0, -1):
        if n % t == 0:
            return t
    return n


def _vmem_capacity_bytes():
    try:
        return int(pltpu.get_tpu_info().vmem_capacity_bytes)
    except Exception:
        return 128 * 1024 * 1024


# ----------------------------- fused decoder-stack kernel ---------------------------
# grid = (batch, layer); the residual stream stays resident in the VMEM output block.

def _decoder_stack_kernel(x0_ref, mod_ref, wqkv_ref, bqkv_ref, gq_ref, gk_ref,
                          wo_ref, bo_ref, go_ref, w1_ref, b1_ref, w2_ref, b2_ref,
                          o_ref, q_sc, k_sc, v_sc, *, num_head, q_tile, kv_tile):
    layer = pl.program_id(1)

    # InitProjection post-processing already applied in XLA; layer 0 only promotes the
    # bf16 initial activation into the resident f32 output block.
    @pl.when(layer == 0)
    def _init():
        o_ref[...] = x0_ref[...].astype(jnp.float32)

    L, D = o_ref.shape
    H = num_head
    hd = D // H
    n_q = L // q_tile
    n_kv = L // kv_tile

    mrows = mod_ref[0, 0]                       # (6, D) f32; rows 0/3 already hold 1+scale
    sc1, sh1, g1 = mrows[0:1], mrows[1:2], mrows[2:3]
    sc2, sh2, g2 = mrows[3:4], mrows[4:5], mrows[5:6]

    wqkv = wqkv_ref[...]                        # (D, 3D) bf16
    bqkv = bqkv_ref[...]                        # (1, 3D) f32
    gq = gq_ref[...]                            # dim_head**-0.5 pre-folded in the wrapper
    gk = gk_ref[...]
    wo = wo_ref[...]
    bo = bo_ref[...]
    go = go_ref[...]
    w1 = w1_ref[...]
    b1 = b1_ref[...]
    w2 = w2_ref[...]
    b2 = b2_ref[...]

    # ---- phase 1 (row-chunked): LN + adaLN + fused QKV projection + RMSNorm; results
    #      stored head-major (H, L, hd) in bf16 VMEM scratch -----------------------------
    def proj_chunk(qi):
        r0 = _aligned(qi * q_tile, q_tile)
        xr = o_ref[pl.ds(r0, q_tile), :]                       # (q_tile, D) f32
        hr = (_layernorm(xr) * sc1 + sh1).astype(jnp.bfloat16)
        qkv = jnp.dot(hr, wqkv, preferred_element_type=jnp.float32) + bqkv
        qn = _rmsnorm(qkv[:, :D], gq)                          # RMSNorm over all heads
        kn = _rmsnorm(qkv[:, D:2 * D], gk)
        vv = qkv[:, 2 * D:]
        for hh in range(H):                                    # static, small head count
            cs = slice(hh * hd, (hh + 1) * hd)
            q_sc[hh, pl.ds(r0, q_tile), :] = qn[:, cs].astype(jnp.bfloat16)
            k_sc[hh, pl.ds(r0, q_tile), :] = kn[:, cs].astype(jnp.bfloat16)
            v_sc[hh, pl.ds(r0, q_tile), :] = vv[:, cs].astype(jnp.bfloat16)

    _foreach(n_q, proj_chunk)

    # ---- phase 2 (row-chunked): flash attention with heads batched on the MXU, output
    #      projection + RMSNorm + gated residual, then the MLP (all row-wise) ------------
    dn_qk = (((2,), (2,)), ((0,), (0,)))        # (H,q,hd) x (H,k,hd) -> (H,q,k)
    dn_pv = (((2,), (1,)), ((0,), (0,)))        # (H,q,k)  x (H,k,hd) -> (H,q,hd)

    def row_chunk(qi):
        r0 = _aligned(qi * q_tile, q_tile)
        qh = q_sc[:, pl.ds(r0, q_tile), :]      # (H, q_tile, hd) bf16

        def kv_step(c0, carry):
            m_i, l_i, acc = carry
            kh = k_sc[:, pl.ds(c0, kv_tile), :]
            vh = v_sc[:, pl.ds(c0, kv_tile), :]
            s = jax.lax.dot_general(qh, kh, dn_qk, preferred_element_type=jnp.float32)
            m_new = jnp.maximum(m_i, jnp.max(s, axis=-1, keepdims=True))
            alpha = jnp.exp(m_i - m_new)
            p = jnp.exp(s - m_new)
            l_new = alpha * l_i + jnp.sum(p, axis=-1, keepdims=True)
            acc_new = alpha * acc + jax.lax.dot_general(
                p.astype(jnp.bfloat16), vh, dn_pv, preferred_element_type=jnp.float32)
            return m_new, l_new, acc_new

        carry = (jnp.full((H, q_tile, 1), -jnp.inf, jnp.float32),
                 jnp.zeros((H, q_tile, 1), jnp.float32),
                 jnp.zeros((H, q_tile, hd), jnp.float32))
        if n_kv <= 4:
            for t in range(n_kv):
                carry = kv_step(t * kv_tile, carry)
        else:
            carry = jax.lax.fori_loop(
                0, n_kv, lambda t, c: kv_step(_aligned(t * kv_tile, kv_tile), c), carry)
        _, l_i, acc = carry
        out = acc * pl.reciprocal(l_i, approx=True)            # (H, q_tile, hd)

        # concat-over-heads @ wo  ==  sum_h out[h] @ wo[h*hd:(h+1)*hd]  (no concat/relayout)
        attn = jnp.dot(out[0].astype(jnp.bfloat16), wo[0:hd, :],
                       preferred_element_type=jnp.float32)
        for hh in range(1, H):
            attn = attn + jnp.dot(out[hh].astype(jnp.bfloat16),
                                  wo[hh * hd:(hh + 1) * hd, :],
                                  preferred_element_type=jnp.float32)
        attn = _rmsnorm(attn + bo, go)

        xr = o_ref[pl.ds(r0, q_tile), :] + g1 * attn           # gated attention residual
        h2 = (_layernorm(xr) * sc2 + sh2).astype(jnp.bfloat16)
        mh = jax.nn.silu(jnp.dot(h2, w1, preferred_element_type=jnp.float32) + b1)
        mo = jnp.dot(mh.astype(jnp.bfloat16), w2, preferred_element_type=jnp.float32) + b2
        o_ref[pl.ds(r0, q_tile), :] = xr + g2 * mo             # Dropout: identity (eval)

    _foreach(n_q, row_chunk)


def decoder_stack_pallas(x0_bf, mod, lw, num_head, q_tile, kv_tile, vmem_limit):
    B, L, D = x0_bf.shape
    NL = mod.shape[0]
    F_ = lw["w1"].shape[-1]
    hd = D // num_head

    bat = lambda b, l: (b, 0, 0)                # per-batch, resident across layers
    lay = lambda b, l: (l, 0, 0)                # per-layer stacked weights

    in_specs = [
        pl.BlockSpec((None, L, D), bat),                                  # x0 (bf16)
        pl.BlockSpec((1, 1, 6, D), lambda b, l: (l, b, 0, 0)),            # adaLN rows (f32)
        pl.BlockSpec((None, D, 3 * D), lay), pl.BlockSpec((None, 1, 3 * D), lay),  # wqkv,bqkv
        pl.BlockSpec((None, 1, D), lay), pl.BlockSpec((None, 1, D), lay),          # gq, gk
        pl.BlockSpec((None, D, D), lay), pl.BlockSpec((None, 1, D), lay),          # wo, bo
        pl.BlockSpec((None, 1, D), lay),                                            # go
        pl.BlockSpec((None, D, F_), lay), pl.BlockSpec((None, 1, F_), lay),        # mlp fc1
        pl.BlockSpec((None, F_, D), lay), pl.BlockSpec((None, 1, D), lay),         # mlp fc2
    ]
    kernel = functools.partial(_decoder_stack_kernel, num_head=num_head,
                               q_tile=q_tile, kv_tile=kv_tile)
    return pl.pallas_call(
        kernel,
        out_shape=jax.ShapeDtypeStruct((B, L, D), jnp.float32),
        grid=(B, NL),
        in_specs=in_specs,
        out_specs=pl.BlockSpec((None, L, D), bat),
        scratch_shapes=[
            pltpu.VMEM((num_head, L, hd), jnp.bfloat16),     # q (head-major)
            pltpu.VMEM((num_head, L, hd), jnp.bfloat16),     # k
            pltpu.VMEM((num_head, L, hd), jnp.bfloat16),     # v
        ],
        compiler_params=pltpu.CompilerParams(
            dimension_semantics=("parallel", "arbitrary"),
            vmem_limit_bytes=vmem_limit),
    )(x0_bf, mod,
      lw["wqkv"], lw["bqkv"], lw["gq"], lw["gk"],
      lw["wo"], lw["bo"], lw["go"],
      lw["w1"], lw["b1"], lw["w2"], lw["b2"])


# ----------------------------- final LN / modulation / linear kernel ----------------
# final_linear(concat(xn, x_copy)) == xn @ W[:D] + x_copy @ W[D:] ; output padded lane-dense.

def _final_kernel(x_ref, xc_ref, fmod_ref, w1_ref, w2_ref, b_ref, o_ref):
    fm = fmod_ref[...]                          # (2, D): [1+scale_final, shift_final]
    xn = (_layernorm(x_ref[...]) * fm[0:1] + fm[1:2]).astype(jnp.bfloat16)
    o = jnp.dot(xn, w1_ref[...], preferred_element_type=jnp.float32)
    o = o + jnp.dot(xc_ref[...], w2_ref[...], preferred_element_type=jnp.float32)
    o_ref[...] = o + b_ref[...]


def final_pallas(x, x_copy, fmod, w1, w2, b, seq_tile):
    B, L, D = x.shape
    Op = w1.shape[1]                            # already padded to a multiple of 128
    nt = L // seq_tile
    return pl.pallas_call(
        _final_kernel,
        out_shape=jax.ShapeDtypeStruct((B, L, Op), jnp.float32),
        grid=(B, nt),
        in_specs=[
            pl.BlockSpec((None, seq_tile, D), lambda bi, ti: (bi, ti, 0)),
            pl.BlockSpec((None, seq_tile, D), lambda bi, ti: (bi, ti, 0)),
            pl.BlockSpec((None, 2, D), lambda bi, ti: (bi, 0, 0)),
            pl.BlockSpec((D, Op), lambda bi, ti: (0, 0)),
            pl.BlockSpec((D, Op), lambda bi, ti: (0, 0)),
            pl.BlockSpec((1, Op), lambda bi, ti: (0, 0)),
        ],
        out_specs=pl.BlockSpec((None, seq_tile, Op), lambda bi, ti: (bi, ti, 0)),
        compiler_params=pltpu.CompilerParams(
            dimension_semantics=("parallel", "parallel")),
    )(x, x_copy, fmod, w1, w2, b)


# ----------------------------- plain-JAX glue ----------------------------------------

def sinusoidal_emb(pos, dim):
    half = dim // 2
    freq = jnp.exp(jnp.arange(half, dtype=jnp.float32) * (-math.log(10000.0) / (half - 1)))
    emb = pos[:, None] * freq[None, :]
    return jnp.concatenate([jnp.sin(emb), jnp.cos(emb)], axis=-1)


def denoising_transformer_forward(params, x, time, *, num_head, max_seq_len=8640):
    B, L, dim_in = x.shape
    D = params["time_w1"].shape[0]
    bf16 = jnp.bfloat16
    assert D % num_head == 0
    hd = D // num_head

    # ---- generation-aware VMEM budget and tile sizes (no hardcoded 64 MiB) ----
    vmem_cap = _vmem_capacity_bytes()
    vmem_limit = int(vmem_cap * 0.85)           # ~54 MiB on v7x, ~109 MiB on v5e/v6e
    tile_target = 512 if vmem_cap <= 64 * 1024 * 1024 else 1024
    row_tile = _pick_tile(L, tile_target)       # query/MLP row chunk inside the decoder
    kv_tile = _pick_tile(L, tile_target)
    seq_tile = _pick_tile(L, tile_target)       # final-projection L tile

    # ---- time embedding MLP (tiny, exact-erf GELU; XLA glue) ----
    t_emb = sinusoidal_emb(time, D)                                               # (B, D)
    t_h = jax.nn.gelu(t_emb @ params["time_w1"] + params["time_b1"], approximate=False)
    t_out = t_h @ params["time_w2"] + params["time_b2"]                           # (B, 3D)
    scale_t, shift_t = t_out[:, :D], t_out[:, D:2 * D]
    encoded_t = t_out[:, 2 * D:]                                                  # (B, D)

    # ---- hoisted adaLN modulation matmuls (M=1 rows; XLA), "+1" pre-folded ----
    scond = jax.nn.silu(encoded_t)
    mod = jnp.einsum("bd,ldm->lbm", scond, params["w_ada"]) + params["b_ada"]     # (NL,B,6D)
    NL = mod.shape[0]
    mod = mod.reshape(NL, B, 6, D)
    mod = mod.at[:, :, 0, :].add(1.0)           # 1 + scale_attn
    mod = mod.at[:, :, 3, :].add(1.0)           # 1 + scale_mlp
    fmod = (scond @ params["w_fada"] + params["b_fada"]).reshape(B, 2, D)
    fmod = fmod.at[:, 0, :].add(1.0)            # 1 + scale_final

    # ---- positional embedding (F.interpolate linear, align_corners=False; XLA glue) ----
    M = max(L, max_seq_len)
    pos = jnp.maximum((jnp.arange(L, dtype=jnp.float32) + 0.5) * (M / L) - 0.5, 0.0)
    p_emb = sinusoidal_emb(pos, D)
    p_h = jax.nn.gelu(p_emb @ params["pos_w1"] + params["pos_b1"], approximate=False)
    pos_emb = p_h @ params["pos_w2"] + params["pos_b2"]                           # (L, D)

    # ---- InitProjection: tiny Conv1d left to XLA, raw reshapes reproduced exactly ----
    K = params["conv_w"].shape[0]
    x_r = jnp.reshape(x, (B, dim_in, L))        # raw reshape, as in the module (NOT transpose)
    x_cl = jnp.transpose(x_r, (0, 2, 1))        # (B, L, Cin) NWC
    conv = jax.lax.conv_general_dilated(
        x_cl, params["conv_w"], window_strides=(1,), padding=[(K // 2, K // 2)],
        dimension_numbers=("NWC", "WIO", "NWC")) + params["conv_b"]
    conv_ol = jnp.transpose(conv, (0, 2, 1))    # (B, D, L) == PyTorch conv output layout
    x_copy = jnp.reshape(conv_ol, (B, L, D))    # raw reshape back, exactly like the module

    # InitProjection post-processing fused here (removed from the decoder kernel)
    x0 = jax.nn.silu(x_copy * (1.0 + scale_t[:, None, :]) + shift_t[:, None, :]) \
        + pos_emb[None, :, :]

    # ---- fused decoder stack: bf16 MXU inputs, f32 residual resident in VMEM ----
    layers = params["layers"]
    lw = {
        "wqkv": layers["wqkv"].astype(bf16), "bqkv": layers["bqkv"],
        "gq": layers["gq"] * (hd ** -0.5),      # fold dim_head**-0.5 into the RMSNorm gain
        "gk": layers["gk"],
        "wo": layers["wo"].astype(bf16), "bo": layers["bo"], "go": layers["go"],
        "w1": layers["w1"].astype(bf16), "b1": layers["b1"],
        "w2": layers["w2"].astype(bf16), "b2": layers["b2"],
    }
    x_out = decoder_stack_pallas(x0.astype(bf16), mod, lw, num_head,
                                 row_tile, kv_tile, vmem_limit)

    # ---- final LN / adaLN / split-concat linear; dim_out padded to lane-dense width ----
    dim_out = params["w_fl1"].shape[1]
    o_pad = ((dim_out + 127) // 128) * 128
    w1p = jnp.pad(params["w_fl1"], ((0, 0), (0, o_pad - dim_out))).astype(bf16)
    w2p = jnp.pad(params["w_fl2"], ((0, 0), (0, o_pad - dim_out))).astype(bf16)
    bp = jnp.pad(params["b_fl"], ((0, 0), (0, o_pad - dim_out)))
    out = final_pallas(x_out, x_copy.astype(bf16), fmod, w1p, w2p, bp, seq_tile)
    return out[:, :, :dim_out]


# ----------------------------- deterministic parameter init --------------------------

def init_params(key, dim_base, dim_in, dim_out, num_layer, dim_ff):
    keys = iter(jax.random.split(key, 64))

    def w(shape, s=0.05):
        return jax.random.normal(next(keys), shape, jnp.float32) * s

    D, F_, NL = dim_base, dim_ff, num_layer
    layers = dict(
        wqkv=w((NL, D, 3 * D)), bqkv=w((NL, 1, 3 * D), 0.01),
        gq=jnp.ones((NL, 1, D), jnp.float32),
        gk=jnp.ones((NL, 1, D), jnp.float32),
        wo=w((NL, D, D)), bo=w((NL, 1, D), 0.01),
        go=jnp.ones((NL, 1, D), jnp.float32),
        w1=w((NL, D, F_)), b1=w((NL, 1, F_), 0.01),
        w2=w((NL, F_, D)), b2=w((NL, 1, D), 0.01),
    )
    params = dict(
        time_w1=w((D, D)), time_b1=w((D,), 0.01),
        time_w2=w((D, 3 * D)), time_b2=w((3 * D,), 0.01),
        pos_w1=w((D, D)), pos_b1=w((D,), 0.01),
        pos_w2=w((D, D)), pos_b2=w((D,), 0.01),
        conv_w=w((5, dim_in, D)),               # (K, Cin, Dbase) == WIO
        conv_b=w((D,), 0.01),
        w_ada=w((NL, D, 6 * D)), b_ada=w((NL, 1, 6 * D), 0.01),
        w_fada=w((D, 2 * D)), b_fada=w((2 * D,), 0.01),
        w_fl1=w((D, dim_out)), w_fl2=w((D, dim_out)), b_fl=w((1, dim_out), 0.01),
        layers=layers,
    )
    return params


# ----------------------------- main ---------------------------------------------------

if __name__ == "__main__":
    B, L, dim_in = 2, 8, 4
    dim_base, num_head, num_layer, dim_ff = 32, 4, 2, 64

    key = jax.random.PRNGKey(0)
    kp, kx, kt = jax.random.split(key, 3)
    params = init_params(kp, dim_base, dim_in, dim_in, num_layer, dim_ff)

    x = jax.random.normal(kx, (B, L, dim_in), jnp.float32)
    time = jax.random.uniform(kt, (B,), jnp.float32) * 1000.0

    fwd = jax.jit(functools.partial(denoising_transformer_forward, num_head=num_head))
    out = fwd(params, x, time)
    out = jax.block_until_ready(out)
    assert out.shape == (B, L, dim_in), out.shape
    assert bool(jnp.all(jnp.isfinite(out)))
    print("KERNEL_OK")
</pallas_src>

<mosaic_0001>
module attributes {stable_mosaic.version = 11 : i64} {
  func.func @_decoder_stack_kernel(%arg0: i32, %arg1: i32, %arg2: memref<1x8x32xbf16, #tpu.memory_space<vmem>>, %arg3: memref<1x1x6x32xf32, #tpu.memory_space<vmem>>, %arg4: memref<1x32x96xbf16, #tpu.memory_space<vmem>>, %arg5: memref<1x1x96xf32, #tpu.memory_space<vmem>>, %arg6: memref<1x1x32xf32, #tpu.memory_space<vmem>>, %arg7: memref<1x1x32xf32, #tpu.memory_space<vmem>>, %arg8: memref<1x32x32xbf16, #tpu.memory_space<vmem>>, %arg9: memref<1x1x32xf32, #tpu.memory_space<vmem>>, %arg10: memref<1x1x32xf32, #tpu.memory_space<vmem>>, %arg11: memref<1x32x64xbf16, #tpu.memory_space<vmem>>, %arg12: memref<1x1x64xf32, #tpu.memory_space<vmem>>, %arg13: memref<1x64x32xbf16, #tpu.memory_space<vmem>>, %arg14: memref<1x1x32xf32, #tpu.memory_space<vmem>>, %arg15: memref<1x8x32xf32, #tpu.memory_space<vmem>>, %arg16: memref<4x8x8xbf16, #tpu.memory_space<vmem>>, %arg17: memref<4x8x8xbf16, #tpu.memory_space<vmem>>, %arg18: memref<4x8x8xbf16, #tpu.memory_space<vmem>>) attributes {dimension_semantics = [#tpu.dimension_semantics<parallel>, #tpu.dimension_semantics<arbitrary>], iteration_bounds = array<i64: 2, 2>, scalar_prefetch = 0 : i64, scratch_operands = 3 : i64, tpu.core_type = #tpu.core_type<tc>, window_params = [{transform_indices = @transform_0, window_bounds = array<i64: 1, 8, 32>}, {transform_indices = @transform_1, window_bounds = array<i64: 1, 1, 6, 32>}, {transform_indices = @transform_2, window_bounds = array<i64: 1, 32, 96>}, {transform_indices = @transform_3, window_bounds = array<i64: 1, 1, 96>}, {transform_indices = @transform_4, window_bounds = array<i64: 1, 1, 32>}, {transform_indices = @transform_5, window_bounds = array<i64: 1, 1, 32>}, {transform_indices = @transform_6, window_bounds = array<i64: 1, 32, 32>}, {transform_indices = @transform_7, window_bounds = array<i64: 1, 1, 32>}, {transform_indices = @transform_8, window_bounds = array<i64: 1, 1, 32>}, {transform_indices = @transform_9, window_bounds = array<i64: 1, 32, 64>}, {transform_indices = @transform_10, window_bounds = array<i64: 1, 1, 64>}, {transform_indices = @transform_11, window_bounds = array<i64: 1, 64, 32>}, {transform_indices = @transform_12, window_bounds = array<i64: 1, 1, 32>}, {transform_indices = @transform_13, window_bounds = array<i64: 1, 8, 32>}]} {
    %c0_i32 = arith.constant 0 : i32
    %0 = arith.cmpi eq, %arg1, %c0_i32 : i32
    %1 = arith.extui %0 : i1 to i32
    %c0_i32_0 = arith.constant 0 : i32
    %2 = arith.cmpi ne, %1, %c0_i32_0 : i32
    scf.if %2 {
      %c0_121 = arith.constant 0 : index
      %c0_122 = arith.constant 0 : index
      %c0_123 = arith.constant 0 : index
      %259 = vector.load %arg2[%c0_121, %c0_122, %c0_123] : memref<1x8x32xbf16, #tpu.memory_space<vmem>>, vector<1x8x32xbf16>
      %260 = vector.shape_cast %259 : vector<1x8x32xbf16> to vector<8x32xbf16>
      %261 = arith.extf %260 : vector<8x32xbf16> to vector<8x32xf32>
      %c0_124 = arith.constant 0 : index
      %c0_125 = arith.constant 0 : index
      %c0_126 = arith.constant 0 : index
      %262 = vector.load %arg15[%c0_124, %c0_125, %c0_126] : memref<1x8x32xf32, #tpu.memory_space<vmem>>, vector<1x8x32xf32>
      %263 = vector.shape_cast %262 : vector<1x8x32xf32> to vector<8x32xf32>
      %264 = vector.shape_cast %261 : vector<8x32xf32> to vector<1x8x32xf32>
      tpu.vector_store %arg15[%c0_124, %c0_125, %c0_126], %264 {strides = array<i32>} : memref<1x8x32xf32, #tpu.memory_space<vmem>>, vector<1x8x32xf32>,
    } else {
    }
    %c0 = arith.constant 0 : index
    %c0_1 = arith.constant 0 : index
    %c0_2 = arith.constant 0 : index
    %c0_3 = arith.constant 0 : index
    %3 = vector.load %arg3[%c0, %c0_1, %c0_2, %c0_3] : memref<1x1x6x32xf32, #tpu.memory_space<vmem>>, vector<1x1x6x32xf32>
    %4 = vector.shape_cast %3 : vector<1x1x6x32xf32> to vector<6x32xf32>
    %5 = vector.extract_strided_slice %4 {offsets = [0, 0], sizes = [1, 32], strides = [1, 1]} : vector<6x32xf32> to vector<1x32xf32>
    %6 = vector.extract_strided_slice %4 {offsets = [1, 0], sizes = [1, 32], strides = [1, 1]} : vector<6x32xf32> to vector<1x32xf32>
    %7 = vector.extract_strided_slice %4 {offsets = [2, 0], sizes = [1, 32], strides = [1, 1]} : vector<6x32xf32> to vector<1x32xf32>
    %8 = vector.extract_strided_slice %4 {offsets = [3, 0], sizes = [1, 32], strides = [1, 1]} : vector<6x32xf32> to vector<1x32xf32>
    %9 = vector.extract_strided_slice %4 {offsets = [4, 0], sizes = [1, 32], strides = [1, 1]} : vector<6x32xf32> to vector<1x32xf32>
    %10 = vector.extract_strided_slice %4 {offsets = [5, 0], sizes = [1, 32], strides = [1, 1]} : vector<6x32xf32> to vector<1x32xf32>
    %c0_4 = arith.constant 0 : index
    %c0_5 = arith.constant 0 : index
    %c0_6 = arith.constant 0 : index
    %11 = vector.load %arg4[%c0_4, %c0_5, %c0_6] : memref<1x32x96xbf16, #tpu.memory_space<vmem>>, vector<1x32x96xbf16>
    %12 = vector.shape_cast %11 : vector<1x32x96xbf16> to vector<32x96xbf16>
    %c0_7 = arith.constant 0 : index
    %c0_8 = arith.constant 0 : index
    %c0_9 = arith.constant 0 : index
    %13 = vector.load %arg5[%c0_7, %c0_8, %c0_9] : memref<1x1x96xf32, #tpu.memory_space<vmem>>, vector<1x1x96xf32>
    %14 = vector.shape_cast %13 : vector<1x1x96xf32> to vector<1x96xf32>
    %c0_10 = arith.constant 0 : index
    %c0_11 = arith.constant 0 : index
    %c0_12 = arith.constant 0 : index
    %15 = vector.load %arg6[%c0_10, %c0_11, %c0_12] : memref<1x1x32xf32, #tpu.memory_space<vmem>>, vector<1x1x32xf32>
    %16 = vector.shape_cast %15 : vector<1x1x32xf32> to vector<1x32xf32>
    %c0_13 = arith.constant 0 : index
    %c0_14 = arith.constant 0 : index
    %c0_15 = arith.constant 0 : index
    %17 = vector.load %arg7[%c0_13, %c0_14, %c0_15] : memref<1x1x32xf32, #tpu.memory_space<vmem>>, vector<1x1x32xf32>
    %18 = vector.shape_cast %17 : vector<1x1x32xf32> to vector<1x32xf32>
    %c0_16 = arith.constant 0 : index
    %c0_17 = arith.constant 0 : index
    %c0_18 = arith.constant 0 : index
    %19 = vector.load %arg8[%c0_16, %c0_17, %c0_18] : memref<1x32x32xbf16, #tpu.memory_space<vmem>>, vector<1x32x32xbf16>
    %20 = vector.shape_cast %19 : vector<1x32x32xbf16> to vector<32x32xbf16>
    %c0_19 = arith.constant 0 : index
    %c0_20 = arith.constant 0 : index
    %c0_21 = arith.constant 0 : index
    %21 = vector.load %arg9[%c0_19, %c0_20, %c0_21] : memref<1x1x32xf32, #tpu.memory_space<vmem>>, vector<1x1x32xf32>
    %22 = vector.shape_cast %21 : vector<1x1x32xf32> to vector<1x32xf32>
    %c0_22 = arith.constant 0 : index
    %c0_23 = arith.constant 0 : index
    %c0_24 = arith.constant 0 : index
    %23 = vector.load %arg10[%c0_22, %c0_23, %c0_24] : memref<1x1x32xf32, #tpu.memory_space<vmem>>, vector<1x1x32xf32>
    %24 = vector.shape_cast %23 : vector<1x1x32xf32> to vector<1x32xf32>
    %c0_25 = arith.constant 0 : index
    %c0_26 = arith.constant 0 : index
    %c0_27 = arith.constant 0 : index
    %25 = vector.load %arg11[%c0_25, %c0_26, %c0_27] : memref<1x32x64xbf16, #tpu.memory_space<vmem>>, vector<1x32x64xbf16>
    %26 = vector.shape_cast %25 : vector<1x32x64xbf16> to vector<32x64xbf16>
    %c0_28 = arith.constant 0 : index
    %c0_29 = arith.constant 0 : index
    %c0_30 = arith.constant 0 : index
    %27 = vector.load %arg12[%c0_28, %c0_29, %c0_30] : memref<1x1x64xf32, #tpu.memory_space<vmem>>, vector<1x1x64xf32>
    %28 = vector.shape_cast %27 : vector<1x1x64xf32> to vector<1x64xf32>
    %c0_31 = arith.constant 0 : index
    %c0_32 = arith.constant 0 : index
    %c0_33 = arith.constant 0 : index
    %29 = vector.load %arg13[%c0_31, %c0_32, %c0_33] : memref<1x64x32xbf16, #tpu.memory_space<vmem>>, vector<1x64x32xbf16>
    %30 = vector.shape_cast %29 : vector<1x64x32xbf16> to vector<64x32xbf16>
    %c0_34 = arith.constant 0 : index
    %c0_35 = arith.constant 0 : index
    %c0_36 = arith.constant 0 : index
    %31 = vector.load %arg14[%c0_34, %c0_35, %c0_36] : memref<1x1x32xf32, #tpu.memory_space<vmem>>, vector<1x1x32xf32>
    %32 = vector.shape_cast %31 : vector<1x1x32xf32> to vector<1x32xf32>
    %c0_37 = arith.constant 0 : index
    %c0_38 = arith.constant 0 : index
    %c0_39 = arith.constant 0 : index
    %33 = vector.load %arg15[%c0_37, %c0_38, %c0_39] : memref<1x8x32xf32, #tpu.memory_space<vmem>>, vector<1x8x32xf32>
    %34 = vector.shape_cast %33 : vector<1x8x32xf32> to vector<8x32xf32>
    %cst = arith.constant dense<0.000000e+00> : vector<8xf32>
    %35 = vector.multi_reduction <add>, %34, %cst [1] : vector<8x32xf32> to vector<8xf32>
    %36 = vector.shape_cast %35 : vector<8xf32> to vector<8x1xf32>
    %cst_40 = arith.constant 3.200000e+01 : f32
    %37 = vector.broadcast %cst_40 : f32 to vector<8x1xf32>
    %38 = arith.divf %36, %37 : vector<8x1xf32>
    %39 = vector.broadcast %38 : vector<8x1xf32> to vector<8x32xf32>
    %40 = arith.subf %34, %39 : vector<8x32xf32>
    %41 = arith.mulf %40, %40 : vector<8x32xf32>
    %cst_41 = arith.constant dense<0.000000e+00> : vector<8xf32>
    %42 = vector.multi_reduction <add>, %41, %cst_41 [1] : vector<8x32xf32> to vector<8xf32>
    %43 = vector.shape_cast %42 : vector<8xf32> to vector<8x1xf32>
    %cst_42 = arith.constant 3.200000e+01 : f32
    %44 = vector.broadcast %cst_42 : f32 to vector<8x1xf32>
    %45 = arith.divf %43, %44 : vector<8x1xf32>
    %46 = vector.broadcast %38 : vector<8x1xf32> to vector<8x32xf32>
    %47 = arith.subf %34, %46 : vector<8x32xf32>
    %cst_43 = arith.constant 9.99999997E-7 : f32
    %48 = vector.broadcast %cst_43 : f32 to vector<8x1xf32>
    %49 = arith.addf %45, %48 : vector<8x1xf32>
    %50 = math.rsqrt %49 : vector<8x1xf32>
    %51 = vector.broadcast %50 : vector<8x1xf32> to vector<8x32xf32>
    %52 = arith.mulf %47, %51 : vector<8x32xf32>
    %53 = vector.broadcast %5 : vector<1x32xf32> to vector<8x32xf32>
    %54 = arith.mulf %52, %53 : vector<8x32xf32>
    %55 = vector.broadcast %6 : vector<1x32xf32> to vector<8x32xf32>
    %56 = arith.addf %54, %55 : vector<8x32xf32>
    %57 = arith.truncf %56 : vector<8x32xf32> to vector<8x32xbf16>
    %cst_44 = arith.constant dense<0.000000e+00> : vector<8x96xf32>
    %58 = tpu.matmul %57, %12, %cst_44 {dimension_numbers = #tpu.dot_dimension_numbers<[1], [0], [0], [1], [0, 0, 1, 1], [], []>} : vector<8x32xbf16>, vector<32x96xbf16>, vector<8x96xf32> -> vector<8x96xf32>
    %59 = vector.broadcast %14 : vector<1x96xf32> to vector<8x96xf32>
    %60 = arith.addf %58, %59 : vector<8x96xf32>
    %61 = vector.extract_strided_slice %60 {offsets = [0, 0], sizes = [8, 32], strides = [1, 1]} : vector<8x96xf32> to vector<8x32xf32>
    %62 = arith.mulf %61, %61 : vector<8x32xf32>
    %cst_45 = arith.constant dense<0.000000e+00> : vector<8xf32>
    %63 = vector.multi_reduction <add>, %62, %cst_45 [1] : vector<8x32xf32> to vector<8xf32>
    %64 = vector.shape_cast %63 : vector<8xf32> to vector<8x1xf32>
    %65 = math.sqrt %64 : vector<8x1xf32>
    %cst_46 = arith.constant 9.99999996E-13 : f32
    %66 = vector.broadcast %cst_46 : f32 to vector<8x1xf32>
    %67 = arith.maximumf %65, %66 : vector<8x1xf32>
    %68 = vector.broadcast %67 : vector<8x1xf32> to vector<8x32xf32>
    %69 = arith.divf %61, %68 : vector<8x32xf32>
    %70 = vector.broadcast %16 : vector<1x32xf32> to vector<8x32xf32>
    %71 = arith.mulf %69, %70 : vector<8x32xf32>
    %cst_47 = arith.constant 5.65685415 : f32
    %72 = vector.broadcast %cst_47 : f32 to vector<8x32xf32>
    %73 = arith.mulf %71, %72 : vector<8x32xf32>
    %74 = vector.extract_strided_slice %60 {offsets = [0, 32], sizes = [8, 32], strides = [1, 1]} : vector<8x96xf32> to vector<8x32xf32>
    %75 = arith.mulf %74, %74 : vector<8x32xf32>
    %cst_48 = arith.constant dense<0.000000e+00> : vector<8xf32>
    %76 = vector.multi_reduction <add>, %75, %cst_48 [1] : vector<8x32xf32> to vector<8xf32>
    %77 = vector.shape_cast %76 : vector<8xf32> to vector<8x1xf32>
    %78 = math.sqrt %77 : vector<8x1xf32>
    %cst_49 = arith.constant 9.99999996E-13 : f32
    %79 = vector.broadcast %cst_49 : f32 to vector<8x1xf32>
    %80 = arith.maximumf %78, %79 : vector<8x1xf32>
    %81 = vector.broadcast %80 : vector<8x1xf32> to vector<8x32xf32>
    %82 = arith.divf %74, %81 : vector<8x32xf32>
    %83 = vector.broadcast %18 : vector<1x32xf32> to vector<8x32xf32>
    %84 = arith.mulf %82, %83 : vector<8x32xf32>
    %cst_50 = arith.constant 5.65685415 : f32
    %85 = vector.broadcast %cst_50 : f32 to vector<8x32xf32>
    %86 = arith.mulf %84, %85 : vector<8x32xf32>
    %87 = vector.extract_strided_slice %60 {offsets = [0, 64], sizes = [8, 32], strides = [1, 1]} : vector<8x96xf32> to vector<8x32xf32>
    %88 = vector.extract_strided_slice %73 {offsets = [0, 0], sizes = [8, 8], strides = [1, 1]} : vector<8x32xf32> to vector<8x8xf32>
    %89 = arith.truncf %88 : vector<8x8xf32> to vector<8x8xbf16>
    %c0_51 = arith.constant 0 : index
    %c0_52 = arith.constant 0 : index
    %c0_53 = arith.constant 0 : index
    %90 = vector.load %arg16[%c0_51, %c0_52, %c0_53] : memref<4x8x8xbf16, #tpu.memory_space<vmem>>, vector<1x8x8xbf16>
    %91 = vector.shape_cast %90 : vector<1x8x8xbf16> to vector<8x8xbf16>
    %92 = vector.shape_cast %89 : vector<8x8xbf16> to vector<1x8x8xbf16>
    tpu.vector_store %arg16[%c0_51, %c0_52, %c0_53], %92 {strides = array<i32>} : memref<4x8x8xbf16, #tpu.memory_space<vmem>>, vector<1x8x8xbf16>,
    %93 = vector.extract_strided_slice %86 {offsets = [0, 0], sizes = [8, 8], strides = [1, 1]} : vector<8x32xf32> to vector<8x8xf32>
    %94 = arith.truncf %93 : vector<8x8xf32> to vector<8x8xbf16>
    %c0_54 = arith.constant 0 : index
    %c0_55 = arith.constant 0 : index
    %c0_56 = arith.constant 0 : index
    %95 = vector.load %arg17[%c0_54, %c0_55, %c0_56] : memref<4x8x8xbf16, #tpu.memory_space<vmem>>, vector<1x8x8xbf16>
    %96 = vector.shape_cast %95 : vector<1x8x8xbf16> to vector<8x8xbf16>
    %97 = vector.shape_cast %94 : vector<8x8xbf16> to vector<1x8x8xbf16>
    tpu.vector_store %arg17[%c0_54, %c0_55, %c0_56], %97 {strides = array<i32>} : memref<4x8x8xbf16, #tpu.memory_space<vmem>>, vector<1x8x8xbf16>,
    %98 = vector.extract_strided_slice %87 {offsets = [0, 0], sizes = [8, 8], strides = [1, 1]} : vector<8x32xf32> to vector<8x8xf32>
    %99 = arith.truncf %98 : vector<8x8xf32> to vector<8x8xbf16>
    %c0_57 = arith.constant 0 : index
    %c0_58 = arith.constant 0 : index
    %c0_59 = arith.constant 0 : index
    %100 = vector.load %arg18[%c0_57, %c0_58, %c0_59] : memref<4x8x8xbf16, #tpu.memory_space<vmem>>, vector<1x8x8xbf16>
    %101 = vector.shape_cast %100 : vector<1x8x8xbf16> to vector<8x8xbf16>
    %102 = vector.shape_cast %99 : vector<8x8xbf16> to vector<1x8x8xbf16>
    tpu.vector_store %arg18[%c0_57, %c0_58, %c0_59], %102 {strides = array<i32>} : memref<4x8x8xbf16, #tpu.memory_space<vmem>>, vector<1x8x8xbf16>,
    %103 = vector.extract_strided_slice %73 {offsets = [0, 8], sizes = [8, 8], strides = [1, 1]} : vector<8x32xf32> to vector<8x8xf32>
    %104 = arith.truncf %103 : vector<8x8xf32> to vector<8x8xbf16>
    %c1 = arith.constant 1 : index
    %c0_60 = arith.constant 0 : index
    %c0_61 = arith.constant 0 : index
    %105 = vector.load %arg16[%c1, %c0_60, %c0_61] : memref<4x8x8xbf16, #tpu.memory_space<vmem>>, vector<1x8x8xbf16>
    %106 = vector.shape_cast %105 : vector<1x8x8xbf16> to vector<8x8xbf16>
    %107 = vector.shape_cast %104 : vector<8x8xbf16> to vector<1x8x8xbf16>
    tpu.vector_store %arg16[%c1, %c0_60, %c0_61], %107 {strides = array<i32>} : memref<4x8x8xbf16, #tpu.memory_space<vmem>>, vector<1x8x8xbf16>,
    %108 = vector.extract_strided_slice %86 {offsets = [0, 8], sizes = [8, 8], strides = [1, 1]} : vector<8x32xf32> to vector<8x8xf32>
    %109 = arith.truncf %108 : vector<8x8xf32> to vector<8x8xbf16>
    %c1_62 = arith.constant 1 : index
    %c0_63 = arith.constant 0 : index
    %c0_64 = arith.constant 0 : index
    %110 = vector.load %arg17[%c1_62, %c0_63, %c0_64] : memref<4x8x8xbf16, #tpu.memory_space<vmem>>, vector<1x8x8xbf16>
    %111 = vector.shape_cast %110 : vector<1x8x8xbf16> to vector<8x8xbf16>
    %112 = vector.shape_cast %109 : vector<8x8xbf16> to vector<1x8x8xbf16>
    tpu.vector_store %arg17[%c1_62, %c0_63, %c0_64], %112 {strides = array<i32>} : memref<4x8x8xbf16, #tpu.memory_space<vmem>>, vector<1x8x8xbf16>,
    %113 = vector.extract_strided_slice %87 {offsets = [0, 8], sizes = [8, 8], strides = [1, 1]} : vector<8x32xf32> to vector<8x8xf32>
    %114 = arith.truncf %113 : vector<8x8xf32> to vector<8x8xbf16>
    %c1_65 = arith.constant 1 : index
    %c0_66 = arith.constant 0 : index
    %c0_67 = arith.constant 0 : index
    %115 = vector.load %arg18[%c1_65, %c0_66, %c0_67] : memref<4x8x8xbf16, #tpu.memory_space<vmem>>, vector<1x8x8xbf16>
    %116 = vector.shape_cast %115 : vector<1x8x8xbf16> to vector<8x8xbf16>
    %117 = vector.shape_cast %114 : vector<8x8xbf16> to vector<1x8x8xbf16>
    tpu.vector_store %arg18[%c1_65, %c0_66, %c0_67], %117 {strides = array<i32>} : memref<4x8x8xbf16, #tpu.memory_space<vmem>>, vector<1x8x8xbf16>,
    %118 = vector.extract_strided_slice %73 {offsets = [0, 16], sizes = [8, 8], strides = [1, 1]} : vector<8x32xf32> to vector<8x8xf32>
    %119 = arith.truncf %118 : vector<8x8xf32> to vector<8x8xbf16>
    %c2 = arith.constant 2 : index
    %c0_68 = arith.constant 0 : index
    %c0_69 = arith.constant 0 : index
    %120 = vector.load %arg16[%c2, %c0_68, %c0_69] : memref<4x8x8xbf16, #tpu.memory_space<vmem>>, vector<1x8x8xbf16>
    %121 = vector.shape_cast %120 : vector<1x8x8xbf16> to vector<8x8xbf16>
    %122 = vector.shape_cast %119 : vector<8x8xbf16> to vector<1x8x8xbf16>
    tpu.vector_store %arg16[%c2, %c0_68, %c0_69], %122 {strides = array<i32>} : memref<4x8x8xbf16, #tpu.memory_space<vmem>>, vector<1x8x8xbf16>,
    %123 = vector.extract_strided_slice %86 {offsets = [0, 16], sizes = [8, 8], strides = [1, 1]} : vector<8x32xf32> to vector<8x8xf32>
    %124 = arith.truncf %123 : vector<8x8xf32> to vector<8x8xbf16>
    %c2_70 = arith.constant 2 : index
    %c0_71 = arith.constant 0 : index
    %c0_72 = arith.constant 0 : index
    %125 = vector.load %arg17[%c2_70, %c0_71, %c0_72] : memref<4x8x8xbf16, #tpu.memory_space<vmem>>, vector<1x8x8xbf16>
    %126 = vector.shape_cast %125 : vector<1x8x8xbf16> to vector<8x8xbf16>
    %127 = vector.shape_cast %124 : vector<8x8xbf16> to vector<1x8x8xbf16>
    tpu.vector_store %arg17[%c2_70, %c0_71, %c0_72], %127 {strides = array<i32>} : memref<4x8x8xbf16, #tpu.memory_space<vmem>>, vector<1x8x8xbf16>,
    %128 = vector.extract_strided_slice %87 {offsets = [0, 16], sizes = [8, 8], strides = [1, 1]} : vector<8x32xf32> to vector<8x8xf32>
    %129 = arith.truncf %128 : vector<8x8xf32> to vector<8x8xbf16>
    %c2_73 = arith.constant 2 : index
    %c0_74 = arith.constant 0 : index
    %c0_75 = arith.constant 0 : index
    %130 = vector.load %arg18[%c2_73, %c0_74, %c0_75] : memref<4x8x8xbf16, #tpu.memory_space<vmem>>, vector<1x8x8xbf16>
    %131 = vector.shape_cast %130 : vector<1x8x8xbf16> to vector<8x8xbf16>
    %132 = vector.shape_cast %129 : vector<8x8xbf16> to vector<1x8x8xbf16>
    tpu.vector_store %arg18[%c2_73, %c0_74, %c0_75], %132 {strides = array<i32>} : memref<4x8x8xbf16, #tpu.memory_space<vmem>>, vector<1x8x8xbf16>,
    %133 = vector.extract_strided_slice %73 {offsets = [0, 24], sizes = [8, 8], strides = [1, 1]} : vector<8x32xf32> to vector<8x8xf32>
    %134 = arith.truncf %133 : vector<8x8xf32> to vector<8x8xbf16>
    %c3 = arith.constant 3 : index
    %c0_76 = arith.constant 0 : index
    %c0_77 = arith.constant 0 : index
    %135 = vector.load %arg16[%c3, %c0_76, %c0_77] : memref<4x8x8xbf16, #tpu.memory_space<vmem>>, vector<1x8x8xbf16>
    %136 = vector.shape_cast %135 : vector<1x8x8xbf16> to vector<8x8xbf16>
    %137 = vector.shape_cast %134 : vector<8x8xbf16> to vector<1x8x8xbf16>
    tpu.vector_store %arg16[%c3, %c0_76, %c0_77], %137 {strides = array<i32>} : memref<4x8x8xbf16, #tpu.memory_space<vmem>>, vector<1x8x8xbf16>,
    %138 = vector.extract_strided_slice %86 {offsets = [0, 24], sizes = [8, 8], strides = [1, 1]} : vector<8x32xf32> to vector<8x8xf32>
    %139 = arith.truncf %138 : vector<8x8xf32> to vector<8x8xbf16>
    %c3_78 = arith.constant 3 : index
    %c0_79 = arith.constant 0 : index
    %c0_80 = arith.constant 0 : index
    %140 = vector.load %arg17[%c3_78, %c0_79, %c0_80] : memref<4x8x8xbf16, #tpu.memory_space<vmem>>, vector<1x8x8xbf16>
    %141 = vector.shape_cast %140 : vector<1x8x8xbf16> to vector<8x8xbf16>
    %142 = vector.shape_cast %139 : vector<8x8xbf16> to vector<1x8x8xbf16>
    tpu.vector_store %arg17[%c3_78, %c0_79, %c0_80], %142 {strides = array<i32>} : memref<4x8x8xbf16, #tpu.memory_space<vmem>>, vector<1x8x8xbf16>,
    %143 = vector.extract_strided_slice %87 {offsets = [0, 24], sizes = [8, 8], strides = [1, 1]} : vector<8x32xf32> to vector<8x8xf32>
    %144 = arith.truncf %143 : vector<8x8xf32> to vector<8x8xbf16>
    %c3_81 = arith.constant 3 : index
    %c0_82 = arith.constant 0 : index
    %c0_83 = arith.constant 0 : index
    %145 = vector.load %arg18[%c3_81, %c0_82, %c0_83] : memref<4x8x8xbf16, #tpu.memory_space<vmem>>, vector<1x8x8xbf16>
    %146 = vector.shape_cast %145 : vector<1x8x8xbf16> to vector<8x8xbf16>
    %147 = vector.shape_cast %144 : vector<8x8xbf16> to vector<1x8x8xbf16>
    tpu.vector_store %arg18[%c3_81, %c0_82, %c0_83], %147 {strides = array<i32>} : memref<4x8x8xbf16, #tpu.memory_space<vmem>>, vector<1x8x8xbf16>,
    %c0_84 = arith.constant 0 : index
    %c0_85 = arith.constant 0 : index
    %c0_86 = arith.constant 0 : index
    %148 = vector.load %arg16[%c0_84, %c0_85, %c0_86] : memref<4x8x8xbf16, #tpu.memory_space<vmem>>, vector<4x8x8xbf16>
    %cst_87 = arith.constant 0xFF800000 : f32
    %149 = vector.broadcast %cst_87 : f32 to vector<4x8x1xf32>
    %cst_88 = arith.constant 0.000000e+00 : f32
    %150 = vector.broadcast %cst_88 : f32 to vector<4x8x1xf32>
    %cst_89 = arith.constant 0.000000e+00 : f32
    %151 = vector.broadcast %cst_89 : f32 to vector<4x8x8xf32>
    %c0_90 = arith.constant 0 : index
    %c0_91 = arith.constant 0 : index
    %c0_92 = arith.constant 0 : index
    %152 = vector.load %arg17[%c0_90, %c0_91, %c0_92] : memref<4x8x8xbf16, #tpu.memory_space<vmem>>, vector<4x8x8xbf16>
    %c0_93 = arith.constant 0 : index
    %c0_94 = arith.constant 0 : index
    %c0_95 = arith.constant 0 : index
    %153 = vector.load %arg18[%c0_93, %c0_94, %c0_95] : memref<4x8x8xbf16, #tpu.memory_space<vmem>>, vector<4x8x8xbf16>
    %cst_96 = arith.constant dense<0.000000e+00> : vector<4x8x8xf32>
    %154 = tpu.matmul %148, %152, %cst_96 {dimension_numbers = #tpu.dot_dimension_numbers<[2], [2], [1], [1], [0, 0, 0, 1, 1, 1], [0], [0]>} : vector<4x8x8xbf16>, vector<4x8x8xbf16>, vector<4x8x8xf32> -> vector<4x8x8xf32>
    %cst_97 = arith.constant dense<0xFF800000> : vector<4x8xf32>
    %155 = vector.multi_reduction <maximumf>, %154, %cst_97 [2] : vector<4x8x8xf32> to vector<4x8xf32>
    %156 = vector.shape_cast %155 : vector<4x8xf32> to vector<4x8x1xf32>
    %157 = arith.maximumf %149, %156 : vector<4x8x1xf32>
    %158 = arith.subf %149, %157 : vector<4x8x1xf32>
    %159 = math.exp %158 : vector<4x8x1xf32>
    %160 = vector.broadcast %157 : vector<4x8x1xf32> to vector<4x8x8xf32>
    %161 = arith.subf %154, %160 : vector<4x8x8xf32>
    %162 = math.exp %161 : vector<4x8x8xf32>
    %163 = arith.mulf %159, %150 : vector<4x8x1xf32>
    %cst_98 = arith.constant dense<0.000000e+00> : vector<4x8xf32>
    %164 = vector.multi_reduction <add>, %162, %cst_98 [2] : vector<4x8x8xf32> to vector<4x8xf32>
    %165 = vector.shape_cast %164 : vector<4x8xf32> to vector<4x8x1xf32>
    %166 = arith.addf %163, %165 : vector<4x8x1xf32>
    %167 = vector.broadcast %159 : vector<4x8x1xf32> to vector<4x8x8xf32>
    %168 = arith.mulf %167, %151 : vector<4x8x8xf32>
    %169 = arith.truncf %162 : vector<4x8x8xf32> to vector<4x8x8xbf16>
    %cst_99 = arith.constant dense<0.000000e+00> : vector<4x8x8xf32>
    %170 = tpu.matmul %169, %153, %cst_99 {dimension_numbers = #tpu.dot_dimension_numbers<[2], [1], [1], [2], [0, 0, 0, 1, 1, 2], [0], [0]>} : vector<4x8x8xbf16>, vector<4x8x8xbf16>, vector<4x8x8xf32> -> vector<4x8x8xf32>
    %171 = arith.addf %168, %170 : vector<4x8x8xf32>
    %172 = tpu.reciprocal %166 {approx = true} : vector<4x8x1xf32> -> vector<4x8x1xf32>
    %173 = vector.broadcast %172 : vector<4x8x1xf32> to vector<4x8x8xf32>
    %174 = arith.mulf %171, %173 : vector<4x8x8xf32>
    %175 = vector.extract_strided_slice %174 {offsets = [0, 0, 0], sizes = [1, 8, 8], strides = [1, 1, 1]} : vector<4x8x8xf32> to vector<1x8x8xf32>
    %176 = vector.shape_cast %175 : vector<1x8x8xf32> to vector<8x8xf32>
    %177 = arith.truncf %176 : vector<8x8xf32> to vector<8x8xbf16>
    %178 = vector.extract_strided_slice %20 {offsets = [0, 0], sizes = [8, 32], strides = [1, 1]} : vector<32x32xbf16> to vector<8x32xbf16>
    %cst_100 = arith.constant dense<0.000000e+00> : vector<8x32xf32>
    %179 = tpu.matmul %177, %178, %cst_100 {dimension_numbers = #tpu.dot_dimension_numbers<[1], [0], [0], [1], [0, 0, 1, 1], [], []>} : vector<8x8xbf16>, vector<8x32xbf16>, vector<8x32xf32> -> vector<8x32xf32>
    %180 = vector.extract_strided_slice %174 {offsets = [1, 0, 0], sizes = [1, 8, 8], strides = [1, 1, 1]} : vector<4x8x8xf32> to vector<1x8x8xf32>
    %181 = vector.shape_cast %180 : vector<1x8x8xf32> to vector<8x8xf32>
    %182 = arith.truncf %181 : vector<8x8xf32> to vector<8x8xbf16>
    %183 = vector.extract_strided_slice %20 {offsets = [8, 0], sizes = [8, 32], strides = [1, 1]} : vector<32x32xbf16> to vector<8x32xbf16>
    %cst_101 = arith.constant dense<0.000000e+00> : vector<8x32xf32>
    %184 = tpu.matmul %182, %183, %cst_101 {dimension_numbers = #tpu.dot_dimension_numbers<[1], [0], [0], [1], [0, 0, 1, 1], [], []>} : vector<8x8xbf16>, vector<8x32xbf16>, vector<8x32xf32> -> vector<8x32xf32>
    %185 = arith.addf %179, %184 : vector<8x32xf32>
    %186 = vector.extract_strided_slice %174 {offsets = [2, 0, 0], sizes = [1, 8, 8], strides = [1, 1, 1]} : vector<4x8x8xf32> to vector<1x8x8xf32>
    %187 = vector.shape_cast %186 : vector<1x8x8xf32> to vector<8x8xf32>
    %188 = arith.truncf %187 : vector<8x8xf32> to vector<8x8xbf16>
    %189 = vector.extract_strided_slice %20 {offsets = [16, 0], sizes = [8, 32], strides = [1, 1]} : vector<32x32xbf16> to vector<8x32xbf16>
    %cst_102 = arith.constant dense<0.000000e+00> : vector<8x32xf32>
    %190 = tpu.matmul %188, %189, %cst_102 {dimension_numbers = #tpu.dot_dimension_numbers<[1], [0], [0], [1], [0, 0, 1, 1], [], []>} : vector<8x8xbf16>, vector<8x32xbf16>, vector<8x32xf32> -> vector<8x32xf32>
    %191 = arith.addf %185, %190 : vector<8x32xf32>
    %192 = vector.extract_strided_slice %174 {offsets = [3, 0, 0], sizes = [1, 8, 8], strides = [1, 1, 1]} : vector<4x8x8xf32> to vector<1x8x8xf32>
    %193 = vector.shape_cast %192 : vector<1x8x8xf32> to vector<8x8xf32>
    %194 = arith.truncf %193 : vector<8x8xf32> to vector<8x8xbf16>
    %195 = vector.extract_strided_slice %20 {offsets = [24, 0], sizes = [8, 32], strides = [1, 1]} : vector<32x32xbf16> to vector<8x32xbf16>
    %cst_103 = arith.constant dense<0.000000e+00> : vector<8x32xf32>
    %196 = tpu.matmul %194, %195, %cst_103 {dimension_numbers = #tpu.dot_dimension_numbers<[1], [0], [0], [1], [0, 0, 1, 1], [], []>} : vector<8x8xbf16>, vector<8x32xbf16>, vector<8x32xf32> -> vector<8x32xf32>
    %197 = arith.addf %191, %196 : vector<8x32xf32>
    %198 = vector.broadcast %22 : vector<1x32xf32> to vector<8x32xf32>
    %199 = arith.addf %197, %198 : vector<8x32xf32>
    %200 = arith.mulf %199, %199 : vector<8x32xf32>
    %cst_104 = arith.constant dense<0.000000e+00> : vector<8xf32>
    %201 = vector.multi_reduction <add>, %200, %cst_104 [1] : vector<8x32xf32> to vector<8xf32>
    %202 = vector.shape_cast %201 : vector<8xf32> to vector<8x1xf32>
    %203 = math.sqrt %202 : vector<8x1xf32>
    %cst_105 = arith.constant 9.99999996E-13 : f32
    %204 = vector.broadcast %cst_105 : f32 to vector<8x1xf32>
    %205 = arith.maximumf %203, %204 : vector<8x1xf32>
    %206 = vector.broadcast %205 : vector<8x1xf32> to vector<8x32xf32>
    %207 = arith.divf %199, %206 : vector<8x32xf32>
    %208 = vector.broadcast %24 : vector<1x32xf32> to vector<8x32xf32>
    %209 = arith.mulf %207, %208 : vector<8x32xf32>
    %cst_106 = arith.constant 5.65685415 : f32
    %210 = vector.broadcast %cst_106 : f32 to vector<8x32xf32>
    %211 = arith.mulf %209, %210 : vector<8x32xf32>
    %c0_107 = arith.constant 0 : index
    %c0_108 = arith.constant 0 : index
    %c0_109 = arith.constant 0 : index
    %212 = vector.load %arg15[%c0_107, %c0_108, %c0_109] : memref<1x8x32xf32, #tpu.memory_space<vmem>>, vector<1x8x32xf32>
    %213 = vector.shape_cast %212 : vector<1x8x32xf32> to vector<8x32xf32>
    %214 = vector.broadcast %7 : vector<1x32xf32> to vector<8x32xf32>
    %215 = arith.mulf %214, %211 : vector<8x32xf32>
    %216 = arith.addf %213, %215 : vector<8x32xf32>
    %cst_110 = arith.constant dense<0.000000e+00> : vector<8xf32>
    %217 = vector.multi_reduction <add>, %216, %cst_110 [1] : vector<8x32xf32> to vector<8xf32>
    %218 = vector.shape_cast %217 : vector<8xf32> to vector<8x1xf32>
    %cst_111 = arith.constant 3.200000e+01 : f32
    %219 = vector.broadcast %cst_111 : f32 to vector<8x1xf32>
    %220 = arith.divf %218, %219 : vector<8x1xf32>
    %221 = vector.broadcast %220 : vector<8x1xf32> to vector<8x32xf32>
    %222 = arith.subf %216, %221 : vector<8x32xf32>
    %223 = arith.mulf %222, %222 : vector<8x32xf32>
    %cst_112 = arith.constant dense<0.000000e+00> : vector<8xf32>
    %224 = vector.multi_reduction <add>, %223, %cst_112 [1] : vector<8x32xf32> to vector<8xf32>
    %225 = vector.shape_cast %224 : vector<8xf32> to vector<8x1xf32>
    %cst_113 = arith.constant 3.200000e+01 : f32
    %226 = vector.broadcast %cst_113 : f32 to vector<8x1xf32>
    %227 = arith.divf %225, %226 : vector<8x1xf32>
    %228 = vector.broadcast %220 : vector<8x1xf32> to vector<8x32xf32>
    %229 = arith.subf %216, %228 : vector<8x32xf32>
    %cst_114 = arith.constant 9.99999997E-7 : f32
    %230 = vector.broadcast %cst_114 : f32 to vector<8x1xf32>
    %231 = arith.addf %227, %230 : vector<8x1xf32>
    %232 = math.rsqrt %231 : vector<8x1xf32>
    %233 = vector.broadcast %232 : vector<8x1xf32> to vector<8x32xf32>
    %234 = arith.mulf %229, %233 : vector<8x32xf32>
    %235 = vector.broadcast %8 : vector<1x32xf32> to vector<8x32xf32>
    %236 = arith.mulf %234, %235 : vector<8x32xf32>
    %237 = vector.broadcast %9 : vector<1x32xf32> to vector<8x32xf32>
    %238 = arith.addf %236, %237 : vector<8x32xf32>
    %239 = arith.truncf %238 : vector<8x32xf32> to vector<8x32xbf16>
    %cst_115 = arith.constant dense<0.000000e+00> : vector<8x64xf32>
    %240 = tpu.matmul %239, %26, %cst_115 {dimension_numbers = #tpu.dot_dimension_numbers<[1], [0], [0], [1], [0, 0, 1, 1], [], []>} : vector<8x32xbf16>, vector<32x64xbf16>, vector<8x64xf32> -> vector<8x64xf32>
    %241 = vector.broadcast %28 : vector<1x64xf32> to vector<8x64xf32>
    %242 = arith.addf %240, %241 : vector<8x64xf32>
    %243 = arith.negf %242 : vector<8x64xf32>
    %244 = math.exp %243 : vector<8x64xf32>
    %cst_116 = arith.constant 1.000000e+00 : f32
    %245 = vector.broadcast %cst_116 : f32 to vector<8x64xf32>
    %246 = arith.addf %245, %244 : vector<8x64xf32>
    %247 = arith.divf %245, %246 : vector<8x64xf32>
    %248 = arith.mulf %242, %247 : vector<8x64xf32>
    %249 = arith.truncf %248 : vector<8x64xf32> to vector<8x64xbf16>
    %cst_117 = arith.constant dense<0.000000e+00> : vector<8x32xf32>
    %250 = tpu.matmul %249, %30, %cst_117 {dimension_numbers = #tpu.dot_dimension_numbers<[1], [0], [0], [1], [0, 0, 1, 1], [], []>} : vector<8x64xbf16>, vector<64x32xbf16>, vector<8x32xf32> -> vector<8x32xf32>
    %251 = vector.broadcast %32 : vector<1x32xf32> to vector<8x32xf32>
    %252 = arith.addf %250, %251 : vector<8x32xf32>
    %253 = vector.broadcast %10 : vector<1x32xf32> to vector<8x32xf32>
    %254 = arith.mulf %253, %252 : vector<8x32xf32>
    %255 = arith.addf %216, %254 : vector<8x32xf32>
    %c0_118 = arith.constant 0 : index
    %c0_119 = arith.constant 0 : index
    %c0_120 = arith.constant 0 : index
    %256 = vector.load %arg15[%c0_118, %c0_119, %c0_120] : memref<1x8x32xf32, #tpu.memory_space<vmem>>, vector<1x8x32xf32>
    %257 = vector.shape_cast %256 : vector<1x8x32xf32> to vector<8x32xf32>
    %258 = vector.shape_cast %255 : vector<8x32xf32> to vector<1x8x32xf32>
    tpu.vector_store %arg15[%c0_118, %c0_119, %c0_120], %258 {strides = array<i32>} : memref<1x8x32xf32, #tpu.memory_space<vmem>>, vector<1x8x32xf32>,
    return
  }
  func.func @transform_0(%arg0: i32, %arg1: i32) -> (i32, i32, i32) {
    %c0_i32 = arith.constant 0 : i32
    %c0_i32_0 = arith.constant 0 : i32
    %c0_i32_1 = arith.constant 0 : i32
    return %arg0, %c0_i32, %c0_i32_0 : i32, i32, i32
  }
  func.func @transform_1(%arg0: i32, %arg1: i32) -> (i32, i32, i32, i32) {
    %c0_i32 = arith.constant 0 : i32
    %c0_i32_0 = arith.constant 0 : i32
    %c0_i32_1 = arith.constant 0 : i32
    return %arg1, %arg0, %c0_i32, %c0_i32_0 : i32, i32, i32, i32
  }
  func.func @transform_2(%arg0: i32, %arg1: i32) -> (i32, i32, i32) {
    %c0_i32 = arith.constant 0 : i32
    %c0_i32_0 = arith.constant 0 : i32
    %c0_i32_1 = arith.constant 0 : i32
    return %arg1, %c0_i32, %c0_i32_0 : i32, i32, i32
  }
  func.func @transform_3(%arg0: i32, %arg1: i32) -> (i32, i32, i32) {
    %c0_i32 = arith.constant 0 : i32
    %c0_i32_0 = arith.constant 0 : i32
    %c0_i32_1 = arith.constant 0 : i32
    return %arg1, %c0_i32, %c0_i32_0 : i32, i32, i32
  }
  func.func @transform_4(%arg0: i32, %arg1: i32) -> (i32, i32, i32) {
    %c0_i32 = arith.constant 0 : i32
    %c0_i32_0 = arith.constant 0 : i32
    %c0_i32_1 = arith.constant 0 : i32
    return %arg1, %c0_i32, %c0_i32_0 : i32, i32, i32
  }
  func.func @transform_5(%arg0: i32, %arg1: i32) -> (i32, i32, i32) {
    %c0_i32 = arith.constant 0 : i32
    %c0_i32_0 = arith.constant 0 : i32
    %c0_i32_1 = arith.constant 0 : i32
    return %arg1, %c0_i32, %c0_i32_0 : i32, i32, i32
  }
  func.func @transform_6(%arg0: i32, %arg1: i32) -> (i32, i32, i32) {
    %c0_i32 = arith.constant 0 : i32
    %c0_i32_0 = arith.constant 0 : i32
    %c0_i32_1 = arith.constant 0 : i32
    return %arg1, %c0_i32, %c0_i32_0 : i32, i32, i32
  }
  func.func @transform_7(%arg0: i32, %arg1: i32) -> (i32, i32, i32) {
    %c0_i32 = arith.constant 0 : i32
    %c0_i32_0 = arith.constant 0 : i32
    %c0_i32_1 = arith.constant 0 : i32
    return %arg1, %c0_i32, %c0_i32_0 : i32, i32, i32
  }
  func.func @transform_8(%arg0: i32, %arg1: i32) -> (i32, i32, i32) {
    %c0_i32 = arith.constant 0 : i32
    %c0_i32_0 = arith.constant 0 : i32
    %c0_i32_1 = arith.constant 0 : i32
    return %arg1, %c0_i32, %c0_i32_0 : i32, i32, i32
  }
  func.func @transform_9(%arg0: i32, %arg1: i32) -> (i32, i32, i32) {
    %c0_i32 = arith.constant 0 : i32
    %c0_i32_0 = arith.constant 0 : i32
    %c0_i32_1 = arith.constant 0 : i32
    return %arg1, %c0_i32, %c0_i32_0 : i32, i32, i32
  }
  func.func @transform_10(%arg0: i32, %arg1: i32) -> (i32, i32, i32) {
    %c0_i32 = arith.constant 0 : i32
    %c0_i32_0 = arith.constant 0 : i32
    %c0_i32_1 = arith.constant 0 : i32
    return %arg1, %c0_i32, %c0_i32_0 : i32, i32, i32
  }
  func.func @transform_11(%arg0: i32, %arg1: i32) -> (i32, i32, i32) {
    %c0_i32 = arith.constant 0 : i32
    %c0_i32_0 = arith.constant 0 : i32
    %c0_i32_1 = arith.constant 0 : i32
    return %arg1, %c0_i32, %c0_i32_0 : i32, i32, i32
  }
  func.func @transform_12(%arg0: i32, %arg1: i32) -> (i32, i32, i32) {
    %c0_i32 = arith.constant 0 : i32
    %c0_i32_0 = arith.constant 0 : i32
    %c0_i32_1 = arith.constant 0 : i32
    return %arg1, %c0_i32, %c0_i32_0 : i32, i32, i32
  }
  func.func @transform_13(%arg0: i32, %arg1: i32) -> (i32, i32, i32) {
    %c0_i32 = arith.constant 0 : i32
    %c0_i32_0 = arith.constant 0 : i32
    %c0_i32_1 = arith.constant 0 : i32
    return %arg0, %c0_i32, %c0_i32_0 : i32, i32, i32
  }
}

module attributes {stable_mosaic.version = 11 : i64} {
  func.func @_final_kernel(%arg0: i32, %arg1: i32, %arg2: memref<1x8x32xf32, #tpu.memory_space<vmem>>, %arg3: memref<1x8x32xbf16, #tpu.memory_space<vmem>>, %arg4: memref<1x2x32xf32, #tpu.memory_space<vmem>>, %arg5: memref<32x128xbf16, #tpu.memory_space<vmem>>, %arg6: memref<32x128xbf16, #tpu.memory_space<vmem>>, %arg7: memref<1x128xf32, #tpu.memory_space<vmem>>, %arg8: memref<1x8x128xf32, #tpu.memory_space<vmem>>) attributes {dimension_semantics = [#tpu.dimension_semantics<parallel>, #tpu.dimension_semantics<parallel>], iteration_bounds = array<i64: 2, 1>, scalar_prefetch = 0 : i64, scratch_operands = 0 : i64, tpu.core_type = #tpu.core_type<tc>, window_params = [{transform_indices = @transform_0, window_bounds = array<i64: 1, 8, 32>}, {transform_indices = @transform_1, window_bounds = array<i64: 1, 8, 32>}, {transform_indices = @transform_2, window_bounds = array<i64: 1, 2, 32>}, {pipeline_mode = #tpu.pipeline_mode<synchronous>, transform_indices = @transform_3, window_bounds = array<i64: 32, 128>}, {pipeline_mode = #tpu.pipeline_mode<synchronous>, transform_indices = @transform_4, window_bounds = array<i64: 32, 128>}, {pipeline_mode = #tpu.pipeline_mode<synchronous>, transform_indices = @transform_5, window_bounds = array<i64: 1, 128>}, {transform_indices = @transform_6, window_bounds = array<i64: 1, 8, 128>}]} {
    %c0 = arith.constant 0 : index
    %c0_0 = arith.constant 0 : index
    %c0_1 = arith.constant 0 : index
    %0 = vector.load %arg4[%c0, %c0_0, %c0_1] : memref<1x2x32xf32, #tpu.memory_space<vmem>>, vector<1x2x32xf32>
    %1 = vector.shape_cast %0 : vector<1x2x32xf32> to vector<2x32xf32>
    %c0_2 = arith.constant 0 : index
    %c0_3 = arith.constant 0 : index
    %c0_4 = arith.constant 0 : index
    %2 = vector.load %arg2[%c0_2, %c0_3, %c0_4] : memref<1x8x32xf32, #tpu.memory_space<vmem>>, vector<1x8x32xf32>
    %3 = vector.shape_cast %2 : vector<1x8x32xf32> to vector<8x32xf32>
    %cst = arith.constant dense<0.000000e+00> : vector<8xf32>
    %4 = vector.multi_reduction <add>, %3, %cst [1] : vector<8x32xf32> to vector<8xf32>
    %5 = vector.shape_cast %4 : vector<8xf32> to vector<8x1xf32>
    %cst_5 = arith.constant 3.200000e+01 : f32
    %6 = vector.broadcast %cst_5 : f32 to vector<8x1xf32>
    %7 = arith.divf %5, %6 : vector<8x1xf32>
    %8 = vector.broadcast %7 : vector<8x1xf32> to vector<8x32xf32>
    %9 = arith.subf %3, %8 : vector<8x32xf32>
    %10 = arith.mulf %9, %9 : vector<8x32xf32>
    %cst_6 = arith.constant dense<0.000000e+00> : vector<8xf32>
    %11 = vector.multi_reduction <add>, %10, %cst_6 [1] : vector<8x32xf32> to vector<8xf32>
    %12 = vector.shape_cast %11 : vector<8xf32> to vector<8x1xf32>
    %cst_7 = arith.constant 3.200000e+01 : f32
    %13 = vector.broadcast %cst_7 : f32 to vector<8x1xf32>
    %14 = arith.divf %12, %13 : vector<8x1xf32>
    %15 = vector.broadcast %7 : vector<8x1xf32> to vector<8x32xf32>
    %16 = arith.subf %3, %15 : vector<8x32xf32>
    %cst_8 = arith.constant 9.99999997E-7 : f32
    %17 = vector.broadcast %cst_8 : f32 to vector<8x1xf32>
    %18 = arith.addf %14, %17 : vector<8x1xf32>
    %19 = math.rsqrt %18 : vector<8x1xf32>
    %20 = vector.broadcast %19 : vector<8x1xf32> to vector<8x32xf32>
    %21 = arith.mulf %16, %20 : vector<8x32xf32>
    %22 = vector.extract_strided_slice %1 {offsets = [0, 0], sizes = [1, 32], strides = [1, 1]} : vector<2x32xf32> to vector<1x32xf32>
    %23 = vector.broadcast %22 : vector<1x32xf32> to vector<8x32xf32>
    %24 = arith.mulf %21, %23 : vector<8x32xf32>
    %25 = vector.extract_strided_slice %1 {offsets = [1, 0], sizes = [1, 32], strides = [1, 1]} : vector<2x32xf32> to vector<1x32xf32>
    %26 = vector.broadcast %25 : vector<1x32xf32> to vector<8x32xf32>
    %27 = arith.addf %24, %26 : vector<8x32xf32>
    %28 = arith.truncf %27 : vector<8x32xf32> to vector<8x32xbf16>
    %c0_9 = arith.constant 0 : index
    %c0_10 = arith.constant 0 : index
    %29 = vector.load %arg5[%c0_9, %c0_10] : memref<32x128xbf16, #tpu.memory_space<vmem>>, vector<32x128xbf16>
    %cst_11 = arith.constant dense<0.000000e+00> : vector<8x128xf32>
    %30 = tpu.matmul %28, %29, %cst_11 {dimension_numbers = #tpu.dot_dimension_numbers<[1], [0], [0], [1], [0, 0, 1, 1], [], []>} : vector<8x32xbf16>, vector<32x128xbf16>, vector<8x128xf32> -> vector<8x128xf32>
    %c0_12 = arith.constant 0 : index
    %c0_13 = arith.constant 0 : index
    %c0_14 = arith.constant 0 : index
    %31 = vector.load %arg3[%c0_12, %c0_13, %c0_14] : memref<1x8x32xbf16, #tpu.memory_space<vmem>>, vector<1x8x32xbf16>
    %32 = vector.shape_cast %31 : vector<1x8x32xbf16> to vector<8x32xbf16>
    %c0_15 = arith.constant 0 : index
    %c0_16 = arith.constant 0 : index
    %33 = vector.load %arg6[%c0_15, %c0_16] : memref<32x128xbf16, #tpu.memory_space<vmem>>, vector<32x128xbf16>
    %cst_17 = arith.constant dense<0.000000e+00> : vector<8x128xf32>
    %34 = tpu.matmul %32, %33, %cst_17 {dimension_numbers = #tpu.dot_dimension_numbers<[1], [0], [0], [1], [0, 0, 1, 1], [], []>} : vector<8x32xbf16>, vector<32x128xbf16>, vector<8x128xf32> -> vector<8x128xf32>
    %35 = arith.addf %30, %34 : vector<8x128xf32>
    %c0_18 = arith.constant 0 : index
    %c0_19 = arith.constant 0 : index
    %36 = vector.load %arg7[%c0_18, %c0_19] : memref<1x128xf32, #tpu.memory_space<vmem>>, vector<1x128xf32>
    %37 = vector.broadcast %36 : vector<1x128xf32> to vector<8x128xf32>
    %38 = arith.addf %35, %37 : vector<8x128xf32>
    %c0_20 = arith.constant 0 : index
    %c0_21 = arith.constant 0 : index
    %c0_22 = arith.constant 0 : index
    %39 = vector.load %arg8[%c0_20, %c0_21, %c0_22] : memref<1x8x128xf32, #tpu.memory_space<vmem>>, vector<1x8x128xf32>
    %40 = vector.shape_cast %39 : vector<1x8x128xf32> to vector<8x128xf32>
    %41 = vector.shape_cast %38 : vector<8x128xf32> to vector<1x8x128xf32>
    tpu.vector_store %arg8[%c0_20, %c0_21, %c0_22], %41 {strides = array<i32>} : memref<1x8x128xf32, #tpu.memory_space<vmem>>, vector<1x8x128xf32>,
    return
  }
  func.func @transform_0(%arg0: i32, %arg1: i32) -> (i32, i32, i32) {
    %c0_i32 = arith.constant 0 : i32
    %c0_i32_0 = arith.constant 0 : i32
    return %arg0, %arg1, %c0_i32 : i32, i32, i32
  }
  func.func @transform_1(%arg0: i32, %arg1: i32) -> (i32, i32, i32) {
    %c0_i32 = arith.constant 0 : i32
    %c0_i32_0 = arith.constant 0 : i32
    return %arg0, %arg1, %c0_i32 : i32, i32, i32
  }
  func.func @transform_2(%arg0: i32, %arg1: i32) -> (i32, i32, i32) {
    %c0_i32 = arith.constant 0 : i32
    %c0_i32_0 = arith.constant 0 : i32
    %c0_i32_1 = arith.constant 0 : i32
    return %arg0, %c0_i32, %c0_i32_0 : i32, i32, i32
  }
  func.func @transform_3(%arg0: i32, %arg1: i32) -> (i32, i32) {
    %c0_i32 = arith.constant 0 : i32
    %c0_i32_0 = arith.constant 0 : i32
    %c0_i32_1 = arith.constant 0 : i32
    return %c0_i32, %c0_i32_0 : i32, i32
  }
  func.func @transform_4(%arg0: i32, %arg1: i32) -> (i32, i32) {
    %c0_i32 = arith.constant 0 : i32
    %c0_i32_0 = arith.constant 0 : i32
    %c0_i32_1 = arith.constant 0 : i32
    return %c0_i32, %c0_i32_0 : i32, i32
  }
  func.func @transform_5(%arg0: i32, %arg1: i32) -> (i32, i32) {
    %c0_i32 = arith.constant 0 : i32
    %c0_i32_0 = arith.constant 0 : i32
    %c0_i32_1 = arith.constant 0 : i32
    return %c0_i32, %c0_i32_0 : i32, i32
  }
  func.func @transform_6(%arg0: i32, %arg1: i32) -> (i32, i32, i32) {
    %c0_i32 = arith.constant 0 : i32
    %c0_i32_0 = arith.constant 0 : i32
    return %arg0, %arg1, %c0_i32 : i32, i32, i32
  }
}

</mosaic_0001>

<bundles_post_ra>
// kernel: denoising_transformer_forward.3
= control target key start
LH: loop header
LB: loop body
LE: loop exit
PB: predicated region body
PF: predicated region fallthrough
CT: control target
= control target key end

     0   :  { %s714_s21 = smov 0   ;;  %s716_s22 = smov 0   ;;  %s781_s0 = inlined_call_operand.vmem [shape: f32[2,8,32], index: 0, kind: input, shape index: {}]   ;;  %s782_s1 = inlined_call_operand.vmem [shape: bf16[2,8,32], index: 1, kind: input, shape index: {}]   ;;  %s783_s2 = inlined_call_operand.vmem [shape: f32[2,2,32], index: 2, kind: input, shape index: {}]   ;;  %s784_s3 = inlined_call_operand.vmem [shape: bf16[32,128], index: 3, kind: input, shape index: {}]   ;;  %s785_s4 = inlined_call_operand.vmem [shape: bf16[32,128], index: 4, kind: input, shape index: {}]   ;;  %s786_s5 = inlined_call_operand.vmem [shape: f32[1,128], index: 5, kind: input, shape index: {}]   ;;  %s787_s6 = inlined_call_operand.vmem [shape: f32[2,8,128], index: 6, kind: output, shape index: {}]  }
   0x1   :  { %s718_s23 = smov 0  }
   0x2 LB: > { %s28_s24 = sadd.s32 1, %s671_s22  ;;  %p585_p0 = scmp.ge.s32.totalorder %s675_s23, 1  ;;  %s675_s23 = sphi %s718_s23, %s16_s23   ;;  %s671_s22 = sphi %s716_s22, %s789_s22   ;;  %s667_s21 = sphi %s714_s21, %s788_s21  }
   0x3   : > { %p30_p1 = scmp.ge.s32.totalorder %s28_s24, 2  ;;  %p253_p2 = scmp.lt.s32.totalorder %s675_s23, 3 }
   0x5   : > { %s791_s24 = smov (%p30_p1, %s28_s24), 0  ;;  %p254_p3 = pnand %p585_p0, %p253_p2 }
   0x6   : > { %p298_p4 = scmp.lt.s32.totalorder (!%p254_p3), %s667_s21, 1  ;;  %vm326_vm0 = vcmask (!%p254_p3), 261120   ;;  %v647_v7 = vld [vmem:[%s785_s4] sm:$0xff] (!%p254_p3)   ;;  %v677_v8 = vmov (!%p254_p3), 0.0   ;;  %v649_v10 = vld [vmem:[%s785_s4 + $0x8] sm:$0xff] (!%p254_p3)   ;;  %vm678_vm1 = vmmov (!%p254_p3), 0   ;;  %v341_v15 = vlaneseq (!%p254_p3) }
   0x7   : > { %257 = sbr.rel (%p254_p3) target bundleno = 550 (0x226), region = 44  ;;  %605 = vmatprep.subr.bf16.mxu0 (!%p254_p3), %v677_v8  ;;  %613 = vmatprep.subr.bf16.mxu1 (!%p254_p3), %v677_v8  ;;  %v648_v9 = vld [vmem:[%s784_s3] sm:$0xff] (!%p254_p3)   ;;  %v650_v11 = vld [vmem:[%s784_s3 + $0x8] sm:$0xff] (!%p254_p3)  }
   0x8   : > { %606 = vmatpush3.bf16.msra.mxu0 (!%p254_p3), %v647_v7  ;;  %614 = vmatpush3.bf16.msra.mxu1 (!%p254_p3), %v648_v9  ;;  %v342_v17 = vshrl.u32 (!%p254_p3), %v341_v15, 7  ;;  %v596_v33 = vld [vmem:[%s786_s5] ss:$0 sm:$0xff] (!%p254_p3) }
   0x9   : > { %607 = vmatprep.subr.bf16.mxu0 (!%p254_p3), %v677_v8  ;;  %609 = vmatprep.mubr.msk.bf16.mxu0 (!%p254_p3), %vm678_vm1, %v677_v8 }
   0xa   : > { %615 = vmatprep.subr.bf16.mxu1 (!%p254_p3), %v677_v8  ;;  %617 = vmatprep.mubr.msk.bf16.mxu1 (!%p254_p3), %vm678_vm1, %v677_v8  ;;  %v343_v18 = vsub.s32 (!%p254_p3), 0, %v342_v17  ;;  %v348_v20 = vsub.s32 (!%p254_p3), 1, %v342_v17 }
   0xc   : > { %608 = vmatpush3.bf16.msra.mxu0 (!%p254_p3), %v649_v10  ;;  %616 = vmatpush3.bf16.msra.mxu1 (!%p254_p3), %v650_v11 }
   0xe   : > { %s793_s21 = smov (!%p298_p4, %s667_s21), 1 }
   0xf   : > { %s586_s25 = sshll.u32 %s793_s21, 3  ;;  %s587_s11 = sshll.u32 %s793_s21, 2 }
  0x10   : > { %s304_s28 = scalar_lea.vmem %s781_s0, %s586_s25  ;;  %s311_s14 = scalar_lea.vmem %s782_s1, %s587_s11 }
  0x11   : > { %v325_v0 = vld [vmem:[%s304_s28] sm:$0xff]  ;;  %s588_s17 = sshll.u32 %s793_s21, 1  ;;  %s322_s30 = scalar_lea.vmem %s787_s6, %s586_s25 }
  0x12   : > { %v327_v1 = vsel %vm326_vm0, %v325_v0, 0.0  ;;  %v356_v12 = vld [vmem:[%s311_s14] sm:$0xf]  ;;  %s315_s20 = scalar_lea.vmem %s783_s2, %s588_s17 }
  0x13   : > { %328 = vadd.xlane.f32.xlu0 %v327_v1  ;;  %610 = vmatmul.mubr.msk.bf16.vlgmr.msra.gmra.mrb[0].mxu0 %vm326_vm0, %v356_v12  ;;  %v324_v19 = vld [vmem:[%s315_s20] sm:$0x3] }
  0x14   : > { %v344_v21 = vrot.slane %v324_v19, %v343_v18  ;;  %v349_v24 = vrot.slane %v324_v19, %v348_v20 }
  0xa0   : > { %v329_v2 = vpop.xlane.xlu0 %328 }
  0xa1   : > { %v331_v3 = vmul.f32 0.03125, %v329_v2 }
  0xa3   : > { %v332_v4 = vsub.f32 %v325_v0, %v331_v3 }
  0xa5   : > { %v333_v5 = vmul.f32 %v332_v4, %v332_v4 }
  0xa7   : > { %v334_v6 = vsel %vm326_vm0, %v333_v5, 0.0 }
  0xa8   : > { %335 = vadd.xlane.f32.xlu0 %v334_v6 }
  0xe6   : > { %v410_v28 = vpop.f32.mrb[0].mxu0 }
  0xe7   : > { %v611_v29 = vpop.f32.mrb[1].mxu0 }
  0xe8   : > { %v413_v30 = vpop.f32.mrb[2].mxu0 }
  0xe9   : > { %v612_v31 = vpop.f32.mrb[3].mxu0 }
 0x135   : > { %v336_v13 = vpop.xlane.xlu0 %335 }
 0x136   : > { %v337_v14 = vmul.f32 0.03125, %v336_v13 }
 0x138   : > { %v338_v16 = vadd.f32 1e-06, %v337_v14 }
 0x13a   : > { %651 = vrsqrt.f32 %v338_v16 }
 0x144   : > { %v652_v22 = vpop.eup %651 }
 0x145   : > { %v340_v23 = vmul.f32 %v652_v22, %v332_v4 }
 0x147   : > { %v345_v25 = vmul.f32 %v344_v21, %v340_v23 }
 0x149   : > { %v350_v26 = vadd.f32 %v349_v24, %v345_v25 }
 0x14b   : > { %v351_v27 = vpack.c.bf16 %v350_v26, %v350_v26 }
 0x14d   : > { %618 = vmatmul.mubr.msk.bf16.vlgmr.msra.gmra.mrb[0].mxu1 %vm326_vm0, %v351_v27 }
 0x220   : > { %v465_v32 = vpop.f32.mrb[0].mxu1 }
 0x221   : > { %v466_v34 = vadd.f32 %v465_v32, %v410_v28  ;;  %v619_v35 = vpop.f32.mrb[1].mxu1 }
 0x222   : > { %v468_v36 = vpop.f32.mrb[2].mxu1 }
 0x223   : > { %v478_v37 = vadd.f32 %v596_v33, %v466_v34  ;;  %v620_v38 = vpop.f32.mrb[3].mxu1 }
 0x225   : > { %479 = vst [vmem:[%s322_s30] sm:$0xff] %v478_v37 }
 0x226 PF: > { %s16_s23 = sadd.s32 1, %s675_s23   ;;  %s788_s21 = smov %s671_s22 }
 0x227   : > { %p13_p5 = scmp.ge.s32.totalorder %s16_s23, 4   ;;  %s789_s22 = smov %s791_s24 }
 0x229   :  { %15 = sbr.rel (!%p13_p5) target bundleno = 2 (0x2), region = 80 }

// kernel: denoising_transformer_forward.2
= control target key start
LH: loop header
LB: loop body
LE: loop exit
PB: predicated region body
PF: predicated region fallthrough
CT: control target
= control target key end

     0   :  { %s4423_s0 = inlined_call_operand.hbm [shape: bf16[2,8,32], index: 0, kind: input, shape index: {}]   ;;  %s4424_s1 = inlined_call_operand.hbm [shape: f32[2,2,6,32], index: 1, kind: input, shape index: {}]   ;;  %s4425_s2 = inlined_call_operand.hbm [shape: bf16[2,32,96], index: 2, kind: input, shape index: {}]   ;;  %s4426_s3 = inlined_call_operand.hbm [shape: f32[2,1,96], index: 3, kind: input, shape index: {}]   ;;  %s4427_s4 = inlined_call_operand.hbm [shape: f32[2,1,32], index: 4, kind: input, shape index: {}]   ;;  %s4428_s5 = inlined_call_operand.hbm [shape: f32[2,1,32], index: 5, kind: input, shape index: {}]   ;;  %s4429_s6 = inlined_call_operand.hbm [shape: bf16[2,32,32], index: 6, kind: input, shape index: {}]   ;;  %s4430_s7 = inlined_call_operand.hbm [shape: f32[2,1,32], index: 7, kind: input, shape index: {}]   ;;  %s4431_s8 = inlined_call_operand.hbm [shape: f32[2,1,32], index: 8, kind: input, shape index: {}]   ;;  %s4432_s9 = inlined_call_operand.hbm [shape: bf16[2,32,64], index: 9, kind: input, shape index: {}]   ;;  %s4433_s10 = inlined_call_operand.hbm [shape: f32[2,1,64], index: 10, kind: input, shape index: {}]   ;;  %s4434_s11 = inlined_call_operand.hbm [shape: bf16[2,64,32], index: 11, kind: input, shape index: {}]   ;;  %s4435_s12 = inlined_call_operand.hbm [shape: f32[2,1,32], index: 12, kind: input, shape index: {}]   ;;  %s4436_s13 = inlined_call_operand.hbm [shape: f32[2,8,32], index: 13, kind: output, shape index: {}]  }
   0x1   :  { %4480 = sst [smem:[#allocation55_spill]] %s4423_s0 }
   0x2   :  { %4481 = sst [smem:[#allocation56_spill]] %s4424_s1 }
   0x3   :  { %4482 = sst [smem:[#allocation57_spill]] %s4425_s2 }
   0x4   :  { %4483 = sst [smem:[#allocation58_spill]] %s4426_s3 }
   0x5   :  { %4484 = sst [smem:[#allocation59_spill]] %s4427_s4 }
   0x6   :  { %4485 = sst [smem:[#allocation60_spill]] %s4428_s5 }
   0x7   :  { %4486 = sst [smem:[#allocation61_spill]] %s4429_s6 }
   0x8   :  { %4487 = sst [smem:[#allocation62_spill]] %s4430_s7 }
   0x9   :  { %4488 = sst [smem:[#allocation63_spill]] %s4431_s8 }
   0xa   :  { %4489 = sst [smem:[#allocation64_spill]] %s4432_s9 }
   0xb   :  { %4490 = sst [smem:[#allocation65_spill]] %s4433_s10 }
   0xc   :  { %4491 = sst [smem:[#allocation66_spill]] %s4434_s11 }
   0xd   :  { %4492 = sst [smem:[#allocation67_spill]] %s4435_s12 }
   0xe   :  { %4493 = sst [smem:[#allocation68_spill]] %s4436_s13 }
   0xf   :  { %18 = vsyncpa [#allocation6], 0 }
  0x10   :  { %20 = vsyncpa [#allocation6 + $0x1], 0 }
  0x11   :  { %21 = vsyncpa [#allocation9], 0 }
  0x12   :  { %23 = vsyncpa [#allocation9 + $0x1], 0 }
  0x13   :  { %24 = vsyncpa [#allocation12], 0 }
  0x14   :  { %26 = vsyncpa [#allocation12 + $0x1], 0 }
  0x15   :  { %27 = vsyncpa [#allocation15], 0 }
  0x16   :  { %29 = vsyncpa [#allocation15 + $0x1], 0 }
  0x17   :  { %30 = vsyncpa [#allocation18], 0 }
  0x18   :  { %32 = vsyncpa [#allocation18 + $0x1], 0 }
  0x19   :  { %33 = vsyncpa [#allocation21], 0 }
  0x1a   :  { %35 = vsyncpa [#allocation21 + $0x1], 0 }
  0x1b   :  { %36 = vsyncpa [#allocation24], 0 }
  0x1c   :  { %38 = vsyncpa [#allocation24 + $0x1], 0 }
  0x1d   :  { %39 = vsyncpa [#allocation7], 0 }
  0x1e   :  { %41 = vsyncpa [#allocation7 + $0x1], 0  ;;  %s3455_s25 = smov 0   ;;  %s3457_s26 = smov 0  }
  0x1f   :  { %s3459_s27 = smov 0   ;;  %s3461_s28 = smov 0  }
  0x20   :  { %s3463_s29 = smov 0   ;;  %s3465_s30 = smov 0  }
  0x21   :  { %s3467_s14 = smov 0   ;;  %s3469_s15 = smov 0  }
  0x22   :  { %s3471_s16 = smov 0   ;;  %s3473_s17 = smov 0  }
  0x23   :  { %s3475_s18 = smov 0   ;;  %s3477_s19 = smov 0  }
  0x24   :  { %s3479_s20 = smov 0   ;;  %s3481_s21 = smov 0  }
  0x25 LB: > { %4494 = sst [smem:[#allocation36_spill]] %s3305_s26  ;;  %s3524_s22 = sadd.s32 4294967295, %s3353_s21   ;;  %s3353_s21 = sphi %s3481_s21, %s47_s21   ;;  %s3349_s20 = sphi %s3479_s20, %s4592_s20   ;;  %s3345_s19 = sphi %s3477_s19, %s4591_s19   ;;  %s3341_s18 = sphi %s3475_s18, %s4597_s18   ;;  %s3337_s17 = sphi %s3473_s17, %s4589_s17   ;;  %s3333_s16 = sphi %s3471_s16, %s4596_s16   ;;  %s3329_s15 = sphi %s3469_s15, %s4595_s15   ;;  %s3325_s14 = sphi %s3467_s14, %s4594_s14   ;;  %s3321_s30 = sphi %s3465_s30, %s4586_s30   ;;  %s3317_s29 = sphi %s3463_s29, %s4585_s29   ;;  %s3313_s28 = sphi %s3461_s28, %s4584_s28   ;;  %s3309_s27 = sphi %s3459_s27, %s4583_s27   ;;  %s3305_s26 = sphi %s3457_s26, %s4582_s26   ;;  %s3301_s25 = sphi %s3455_s25, %s4581_s25  }
  0x26   : > { %4495 = sst [smem:[#allocation37_spill]] %s3309_s27  ;;  %s56_s23 = sadd.s32 1, %s3345_s19 }
  0x27   : > { %4496 = sst [smem:[#allocation38_spill]] %s3317_s29  ;;  %p57_p0 = scmp.ge.s32.totalorder %s56_s23, 2 }
  0x28   : > { %4497 = sst [smem:[#allocation39_spill]] %s3321_s30  ;;  %s59_s24 = sadd.s32 1, %s3349_s20 }
  0x29   : > { %4498 = sst [smem:[#allocation40_spill]] %s3325_s14  ;;  %p4452_p1 = scmp.eq.s32.totalorder %s3353_s21, 0 }
  0x2a   : > { %4499 = sst [smem:[#allocation41_spill]] %s3333_s16  ;;  %p4451_p2 = scmp.eq.s32.totalorder %s3524_s22, 0 }
  0x2b   : > { %4500 = sst [smem:[#allocation42_spill]] %s3337_s17  ;;  %s4599_s23 = smov (%p57_p0, %s56_s23), 0 }
  0x2c   : > { %4501 = sst [smem:[#allocation43_spill]] %s3341_s18  ;;  %s4601_s24 = smov (!%p57_p0, %s59_s24), %s3349_s20 }
  0x2d   : > { %4502 = sst [smem:[#allocation44_spill]] %s3345_s19  ;;  %s89_s13 = ssub.s32 %s3345_s19, %s4599_s23 }
  0x2e   : > { %4503 = sst [smem:[#allocation45_spill]] %s3349_s20  ;;  %s94_s18 = sadd.s32 1, %s3321_s30 }
  0x2f   : > { %4504 = sst [smem:[#allocation46_spill]] %s4599_s23  ;;  %p61_p3 = scmp.ge.s32.totalorder %s4601_s24, 2 }
  0x30   : > { %p101_p4 = scmp.ne.s32.totalorder %s3321_s30, %s3317_s29  ;;  %p107_p5 = scmp.ne.s32.totalorder %s3317_s29, %s3313_s28 }
  0x31   : > { %p118_p6 = scmp.eq.s32.totalorder %s89_s13, 0  ;;  %s4603_s24 = smov (%p61_p3, %s4601_s24), 0 }
  0x32   : > { %4505 = sst [smem:[#allocation47_spill]] %s4603_s24  ;;  %p3543_p7 = por %p101_p4, %p4452_p1 }
  0x33   : > { %p3549_p8 = por %p107_p5, %p4451_p2  ;;  %s3555_s12 = ssub.s32 %s3349_s20, %s4603_s24 }
  0x34   : > { %s120_s28 = sadd.s32 1, %s3309_s27  ;;  %s91_s29 = sor.u32 %s89_s13, %s3555_s12 }
  0x35   : > { %s4507_s23 = scalar_select %p3549_p8, 1, 0 }
  0x36   : > { %p127_p9 = scmp.ne.s32.totalorder %s3309_s27, %s3305_s26  ;;  %p92_p10 = scmp.eq.s32.totalorder %s91_s29, 0 }
  0x37   : > { %4508 = sst [smem:[#allocation48_spill]] %s4507_s23  ;;  %p133_p11 = scmp.ne.s32.totalorder %s3305_s26, %s3301_s25 }
  0x38   : > { %s3564_s10 = scalar_select %p118_p6, %s3309_s27, %s120_s28  }
  0x39   : > { %s3567_s8 = scalar_select %p92_p10, %s3321_s30, %s94_s18  }
  0x3a   : > { %4509 = sst [smem:[#allocation49_spill]] %s3564_s10  ;;  %p3571_p12 = por %p127_p9, %p4452_p1 }
  0x3b   : > { %4510 = sst [smem:[#allocation50_spill]] %s3567_s8  ;;  %p3577_p13 = por %p133_p11, %p4451_p2 }
  0x3c   : > { %p4450_p0 = scmp.lt.s32.totalorder %s3353_s21, 4  ;;  %s3583_s25 = sand.u32 1, %s3353_s21  }
  0x3d   : > { %s4512_s13 = scalar_select %p3577_p13, 1, 0 }
  0x3e   : > { %s463_s29 = sand.u32 1, %s3321_s30   ;;  %s2325_s28 = sshll.u32 %s3345_s19, 1 }
  0x3f   : > { %4513 = sst [smem:[#allocation51_spill]] %s4512_s13  ;;  %s2324_s18 = sshll.u32 %s463_s29, 3 }
  0x40   : > { %s470_s24 = sadd.s32 %s3349_s20, %s2325_s28  ;;  %s465_s8 = scalar_lea.vmem [#allocation8], %s2324_s18 }
  0x41   : > { %s474_s10 = sshll.u32 %s465_s8, 4  ;;  %s2326_s26 = sshll.u32 %s470_s24, 7  ;;  %s3588_s10 = int_to_ptr.vmem [resolvable:$true] %s474_s10 }
  0x42   : > { %s4514_s1 = sld [smem:[#allocation56_spill]]  ;;  %p3599_p3 = pnand %p4450_p0, %p3543_p7 }
  0x43   : > { %p3607_p4 = pnand %p4450_p0, %p3571_p12  ;;  %s4455_s4 = scalar_lea.sflag [#allocation9], %s3583_s25 }
  0x44   : > { %p2791_p10 = pneg %p3599_p3 }
  0x45   : > { %s4516_s8 = scalar_select %p3607_p4, 1, 0 }
  0x48   : > { %s3593_s2 = scalar_lea.hbm %s4514_s1, %s2326_s26  ;;  %s2794_s23 = scalar_lea.hbm %s4514_s1, 512 }
  0x49   : > { %s2789_s6 = scalar_lea.hbm %s3593_s2, 128  ;;  %p2795_p12 = scmp.lt.u32.totalorder %s3593_s2, %s4514_s1 }
  0x4a   : > { %p2790_p9 = scmp.ne.s32.totalorder %s3593_s2, %s2789_s6  ;;  %p2796_p0 = scmp.lt.u32.totalorder %s2794_s23, %s2789_s6 }
  0x4b   : > { %p2798_p1 = scmp.lt.u32.totalorder %s2789_s6, %s3593_s2 }
  0x4c   : > { %p2792_p7 = pnand %p2791_p10, %p2790_p9  ;;  %p2797_p2 = por %p2796_p0, %p2795_p12 }
  0x4e   : > { %p2793_p11 = pneg %p2792_p7  ;;  %p2799_p5 = por %p2798_p1, %p2797_p2 }
  0x50   : > { %p2800_p6 = pnand %p2799_p5, %p2793_p11 }
  0x52   : > { %2803 = shalt.err (!%p2800_p6)
}
  0x53   : > { %s2804_s28 = scalar_lea.vmem %s3588_s10, 128  ;;  %s3355_s26 = smov [#allocation8]  }
  0x54   : > { %p2805_p9 = scmp.ne.s32.totalorder %s3588_s10, %s2804_s28  ;;  %s2809_s17 = sshll.u32 %s3355_s26, 4  ;;  %s2810_s17 = int_to_ptr.vmem [resolvable:$false] %s2809_s17 }
  0x55   : > { %s2811_s24 = scalar_lea.vmem %s2810_s17, 256  ;;  %p2812_p8 = scmp.lt.s32.totalorder %s3588_s10, %s2810_s17 }
  0x56   : > { %p2807_p7 = pnand %p2805_p9, %p2791_p10  ;;  %p2813_p0 = scmp.lt.s32.totalorder %s2811_s24, %s2804_s28 }
  0x58   : > { %p2808_p13 = pneg %p2807_p7  ;;  %p2814_p12 = por %p2813_p0, %p2812_p8 }
  0x5a   : > { %p2815_p1 = pnand %p2814_p12, %p2808_p13 }
  0x5c   : > { %2818 = shalt.err (!%p2815_p1)
}
  0x5d   : > { %2569 = dma.hbm_to_vmem [thread:$0]  (!%p3599_p3), %s3593_s2, 128, %s3588_s10, %s4455_s4  }
  0x5e   : > { %p4517_p2 = scmp.lt.s32.totalorder %s3353_s21, 5  ;;  %p4518_p5 = scmp.ge.s32.totalorder %s3353_s21, 1 }
  0x5f   : > { %s3650_s23 = sand.u32 1, %s3309_s27   ;;  %s3653_s29 = sshll.u32 %s3345_s19, 4 }
  0x60   : > { %p3645_p6 = pnand %p4518_p5, %p4517_p2  ;;  %s4521_s3 = sld [smem:[#allocation58_spill]] }
  0x61   : > { %s505_s2 = scalar_lea.vmem [#allocation11], %s3650_s23  ;;  %p3669_p13 = pneg %p3607_p4 }
  0x62   : > { %s4519_s6 = scalar_select %p3645_p6, 1, 0 }
  0x63   : > { %s512_s10 = sshll.u32 %s505_s2, 4  ;;  %s3662_s10 = int_to_ptr.vmem [resolvable:$true] %s512_s10 }
  0x64   : > { %4520 = sst [smem:[#allocation52_spill]] %s4519_s6 }
  0x66   : > { %s3659_s26 = scalar_lea.hbm %s4521_s3, %s3653_s29  ;;  %s2824_s1 = scalar_lea.hbm %s4521_s3, 32 }
  0x67   : > { %s2819_s24 = scalar_lea.hbm %s3659_s26, 16  ;;  %p2825_p11 = scmp.lt.u32.totalorder %s3659_s26, %s4521_s3 }
  0x68   : > { %p2820_p8 = scmp.ne.s32.totalorder %s3659_s26, %s2819_s24  ;;  %p2826_p9 = scmp.lt.u32.totalorder %s2824_s1, %s2819_s24 }
  0x69   : > { %p2828_p0 = scmp.lt.u32.totalorder %s2819_s24, %s3659_s26 }
  0x6a   : > { %p2822_p3 = pnand %p3669_p13, %p2820_p8  ;;  %p2827_p7 = por %p2826_p9, %p2825_p11 }
  0x6c   : > { %p2823_p10 = pneg %p2822_p3  ;;  %p2829_p12 = por %p2828_p0, %p2827_p7 }
  0x6e   : > { %p2830_p1 = pnand %p2829_p12, %p2823_p10 }
  0x70   : > { %2833 = shalt.err (!%p2830_p1)
}
  0x71   : > { %s2834_s17 = scalar_lea.vmem %s3662_s10, 16  ;;  %s3356_s18 = smov [#allocation11]  }
  0x72   : > { %p2835_p2 = scmp.ne.s32.totalorder %s3662_s10, %s2834_s17  ;;  %s2839_s28 = sshll.u32 %s3356_s18, 4  ;;  %s2840_s28 = int_to_ptr.vmem [resolvable:$false] %s2839_s28 }
  0x73   : > { %s2841_s30 = scalar_lea.vmem %s2840_s28, 32  ;;  %p2842_p3 = scmp.lt.s32.totalorder %s3662_s10, %s2840_s28 }
  0x74   : > { %p2837_p5 = pnand %p2835_p2, %p3669_p13  ;;  %p2843_p6 = scmp.lt.s32.totalorder %s2841_s30, %s2834_s17 }
  0x76   : > { %p2838_p8 = pneg %p2837_p5  ;;  %p2844_p11 = por %p2843_p6, %p2842_p3 }
  0x78   : > { %p2845_p9 = pnand %p2844_p11, %p2838_p8 }
  0x7a   : > { %2848 = shalt.err (!%p2845_p9)
}
  0x7b   : > { %s4523_s1 = scalar_lea.sflag [#allocation12], %s3583_s25  ;;  %s4524_s5 = sld [smem:[#allocation60_spill]] }
  0x7c   : > { %2575 = dma.hbm_to_vmem [thread:$0]  (!%p3607_p4), %s3659_s26, 16, %s3662_s10, %s4523_s1  }
  0x7d   : > { %s539_s17 = scalar_lea.vmem [#allocation14], %s3650_s23 }
  0x7e   : > { %s546_s28 = sshll.u32 %s539_s17, 4  ;;  %s547_s28 = int_to_ptr.vmem [resolvable:$true] %s546_s28 }
  0x81   : > { %s3698_s18 = scalar_lea.hbm %s4524_s5, %s3653_s29  ;;  %s2854_s10 = scalar_lea.hbm %s4524_s5, 32 }
  0x82   : > { %s2849_s3 = scalar_lea.hbm %s3698_s18, 16  ;;  %p2855_p0 = scmp.lt.u32.totalorder %s3698_s18, %s4524_s5 }
  0x83   : > { %p2850_p6 = scmp.ne.s32.totalorder %s3698_s18, %s2849_s3  ;;  %p2856_p12 = scmp.lt.u32.totalorder %s2854_s10, %s2849_s3 }
  0x84   : > { %p2858_p2 = scmp.lt.u32.totalorder %s2849_s3, %s3698_s18 }
  0x85   : > { %p2852_p10 = pnand %p2850_p6, %p3669_p13  ;;  %p2857_p1 = por %p2856_p12, %p2855_p0 }
  0x87   : > { %p2853_p7 = pneg %p2852_p10  ;;  %p2859_p5 = por %p2858_p2, %p2857_p1 }
  0x89   : > { %p2860_p8 = pnand %p2859_p5, %p2853_p7 }
  0x8b   : > { %2863 = shalt.err (!%p2860_p8)
}
  0x8c   : > { %s2864_s2 = scalar_lea.vmem %s547_s28, 16  ;;  %s3357_s17 = smov [#allocation14]  }
  0x8d   : > { %p2865_p3 = scmp.ne.s32.totalorder %s547_s28, %s2864_s2  ;;  %s2869_s30 = sshll.u32 %s3357_s17, 4  ;;  %s2870_s30 = int_to_ptr.vmem [resolvable:$false] %s2869_s30 }
  0x8e   : > { %s2871_s27 = scalar_lea.vmem %s2870_s30, 32  ;;  %p2872_p6 = scmp.lt.s32.totalorder %s547_s28, %s2870_s30 }
  0x8f   : > { %p2867_p11 = pnand %p2865_p3, %p3669_p13  ;;  %p2873_p10 = scmp.lt.s32.totalorder %s2871_s27, %s2864_s2 }
  0x91   : > { %p2868_p9 = pneg %p2867_p11  ;;  %p2874_p4 = por %p2873_p10, %p2872_p6 }
  0x93   : > { %p2875_p0 = pnand %p2874_p4, %p2868_p9 }
  0x95   : > { %2878 = shalt.err (!%p2875_p0)
}
  0x96   : > { %p4525_p12 = scmp.ne.s32.totalorder %s4516_s8, 0  ;;  %s4526_s3 = scalar_lea.sflag [#allocation15], %s3583_s25 }
  0x97   : > { %s4527_s7 = sld [smem:[#allocation62_spill]]  ;;  %s577_s30 = scalar_lea.vmem [#allocation17], %s3650_s23 }
  0x98   : > { %2581 = dma.hbm_to_vmem [thread:$0]  (!%p4525_p12), %s3698_s18, 16, %s547_s28, %s4526_s3  }
  0x99   : > { %s584_s24 = sshll.u32 %s577_s30, 4  ;;  %s3731_s2 = sshll.u32 %s3650_s23, 4  ;;  %s3728_s24 = int_to_ptr.vmem [resolvable:$true] %s584_s24 }
  0x9a   : > { %s4460_s17 = scalar_lea.sflag [#allocation18], %s3583_s25 }
  0x9d   : > { %s3725_s1 = scalar_lea.hbm %s4527_s7, %s3653_s29  ;;  %s2884_s3 = scalar_lea.hbm %s4527_s7, 32 }
  0x9e   : > { %s2879_s27 = scalar_lea.hbm %s3725_s1, 16  ;;  %p2885_p2 = scmp.lt.u32.totalorder %s3725_s1, %s4527_s7 }
  0x9f   : > { %p2880_p4 = scmp.ne.s32.totalorder %s3725_s1, %s2879_s27  ;;  %p2886_p5 = scmp.lt.u32.totalorder %s2884_s3, %s2879_s27 }
  0xa0   : > { %p2888_p3 = scmp.lt.u32.totalorder %s2879_s27, %s3725_s1 }
  0xa1   : > { %p2882_p7 = pnand %p2880_p4, %p3669_p13  ;;  %p2887_p8 = por %p2886_p5, %p2885_p2 }
  0xa3   : > { %p2883_p1 = pneg %p2882_p7  ;;  %p2889_p11 = por %p2888_p3, %p2887_p8 }
  0xa5   : > { %p2890_p9 = pnand %p2889_p11, %p2883_p1 }
  0xa7   : > { %2893 = shalt.err (!%p2890_p9)
}
  0xa8   : > { %s2894_s30 = scalar_lea.vmem %s3728_s24, 16  ;;  %s3358_s18 = smov [#allocation17]  }
  0xa9   : > { %p2895_p6 = scmp.ne.s32.totalorder %s3728_s24, %s2894_s30  ;;  %s2899_s28 = sshll.u32 %s3358_s18, 4  ;;  %s2900_s28 = int_to_ptr.vmem [resolvable:$false] %s2899_s28 }
  0xaa   : > { %s2901_s26 = scalar_lea.vmem %s2900_s28, 32  ;;  %p2902_p4 = scmp.lt.s32.totalorder %s3728_s24, %s2900_s28 }
  0xab   : > { %p2897_p10 = pnand %p2895_p6, %p3669_p13  ;;  %p2903_p7 = scmp.lt.s32.totalorder %s2901_s26, %s2894_s30 }
  0xad   : > { %p2898_p0 = pneg %p2897_p10  ;;  %p2904_p2 = por %p2903_p7, %p2902_p4 }
  0xaf   : > { %p2905_p5 = pnand %p2904_p2, %p2898_p0 }
  0xb1   : > { %2908 = shalt.err (!%p2905_p5)
}
  0xb2   : > { %2587 = dma.hbm_to_vmem [thread:$0]  (!%p4525_p12), %s3725_s1, 16, %s3728_s24, %s4460_s17  }
  0xb3   : > { %s3758_s27 = sshll.u32 %s3345_s19, 8  ;;  %s4528_s9 = sld [smem:[#allocation64_spill]] }
  0xb4   : > { %s612_s18 = scalar_lea.vmem [#allocation20], %s3731_s2  ;;  %s2342_s26 = sshll.u32 %s3650_s23, 5 }
  0xb5   : > { %s619_s28 = sshll.u32 %s612_s18, 4  ;;  %s4465_s5 = scalar_lea.sflag [#allocation21], %s3583_s25  ;;  %s3767_s28 = int_to_ptr.vmem [resolvable:$true] %s619_s28 }
  0xb9   : > { %s3764_s30 = scalar_lea.hbm %s4528_s9, %s3758_s27  ;;  %s2914_s3 = scalar_lea.hbm %s4528_s9, 512 }
  0xba   : > { %s2909_s7 = scalar_lea.hbm %s3764_s30, 256  ;;  %p2915_p11 = scmp.lt.u32.totalorder %s3764_s30, %s4528_s9 }
  0xbb   : > { %p2910_p1 = scmp.ne.s32.totalorder %s3764_s30, %s2909_s7  ;;  %p2916_p9 = scmp.lt.u32.totalorder %s2914_s3, %s2909_s7 }
  0xbc   : > { %p2918_p10 = scmp.lt.u32.totalorder %s2909_s7, %s3764_s30 }
  0xbd   : > { %p2912_p8 = pnand %p2910_p1, %p3669_p13  ;;  %p2917_p6 = por %p2916_p9, %p2915_p11 }
  0xbf   : > { %p2913_p3 = pneg %p2912_p8  ;;  %p2919_p0 = por %p2918_p10, %p2917_p6 }
  0xc1   : > { %p2920_p4 = pnand %p2919_p0, %p2913_p3 }
  0xc3   : > { %2923 = shalt.err (!%p2920_p4)
}
  0xc4   : > { %s2924_s18 = scalar_lea.vmem %s3767_s28, 256  ;;  %s3359_s1 = smov [#allocation20]  }
  0xc5   : > { %p2925_p7 = scmp.ne.s32.totalorder %s3767_s28, %s2924_s18  ;;  %s2929_s24 = sshll.u32 %s3359_s1, 4  ;;  %s2930_s24 = int_to_ptr.vmem [resolvable:$false] %s2929_s24 }
  0xc6   : > { %s2931_s17 = scalar_lea.vmem %s2930_s24, 512  ;;  %p2932_p1 = scmp.lt.s32.totalorder %s3767_s28, %s2930_s24 }
  0xc7   : > { %p2927_p2 = pnand %p2925_p7, %p3669_p13  ;;  %p2933_p8 = scmp.lt.s32.totalorder %s2931_s17, %s2924_s18 }
  0xc9   : > { %p2928_p5 = pneg %p2927_p2  ;;  %p2934_p11 = por %p2933_p8, %p2932_p1 }
  0xcb   : > { %p2935_p9 = pnand %p2934_p11, %p2928_p5 }
  0xcd   : > { %2938 = shalt.err (!%p2935_p9)
}
  0xce   : > { %s4466_s7 = smov 64   ;;  %s4468_s3 = smov 4  }
  0xcf   : > { %2593 = dma.hbm_to_vmem [thread:$0]  (!%p4525_p12), %s3764_s30, 256, %s3767_s28, %s4465_s5, %s4466_s7, %s4466_s7, %s4468_s3  }
  0xd0   : > { %s2396_s10 = sshll.u32 %s3345_s19, 9  ;;  %s4529_s11 = sld [smem:[#allocation66_spill]] }
  0xd1   : > { %s650_s17 = scalar_lea.vmem [#allocation23], %s2342_s26  ;;  %s4464_s13 = scalar_lea.sflag [#allocation24], %s3583_s25 }
  0xd2   : > { %s657_s9 = sshll.u32 %s650_s17, 4  ;;  %s3805_s9 = int_to_ptr.vmem [resolvable:$true] %s657_s9 }
  0xd6   : > { %s3801_s24 = scalar_lea.hbm %s4529_s11, %s2396_s10  ;;  %s2944_s10 = scalar_lea.hbm %s4529_s11, 1024 }
  0xd7   : > { %s2939_s6 = scalar_lea.hbm %s3801_s24, 512  ;;  %p2945_p0 = scmp.lt.u32.totalorder %s3801_s24, %s4529_s11 }
  0xd8   : > { %p2940_p3 = scmp.ne.s32.totalorder %s3801_s24, %s2939_s6  ;;  %p2946_p4 = scmp.lt.u32.totalorder %s2944_s10, %s2939_s6 }
  0xd9   : > { %p2948_p2 = scmp.lt.u32.totalorder %s2939_s6, %s3801_s24 }
  0xda   : > { %p2942_p6 = pnand %p2940_p3, %p3669_p13  ;;  %p2947_p7 = por %p2946_p4, %p2945_p0 }
  0xdc   : > { %p2943_p10 = pneg %p2942_p6  ;;  %p2949_p5 = por %p2948_p2, %p2947_p7 }
  0xde   : > { %p2950_p1 = pnand %p2949_p5, %p2943_p10 }
  0xe0   : > { %2953 = shalt.err (!%p2950_p1)
}
  0xe1   : > { %s2954_s26 = scalar_lea.vmem %s3805_s9, 512  ;;  %s3362_s17 = smov [#allocation23]  }
  0xe2   : > { %p2955_p8 = scmp.ne.s32.totalorder %s3805_s9, %s2954_s26  ;;  %s2959_s30 = sshll.u32 %s3362_s17, 4  ;;  %s2960_s30 = int_to_ptr.vmem [resolvable:$false] %s2959_s30 }
  0xe3   : > { %s2961_s28 = scalar_lea.vmem %s2960_s30, 1024  ;;  %p2962_p3 = scmp.lt.s32.totalorder %s3805_s9, %s2960_s30 }
  0xe4   : > { %p2957_p11 = pnand %p2955_p8, %p3669_p13  ;;  %p2963_p6 = scmp.lt.s32.totalorder %s2961_s28, %s2954_s26 }
  0xe6   : > { %p2958_p9 = pneg %p2957_p11  ;;  %p2964_p0 = por %p2963_p6, %p2962_p3 }
  0xe8   : > { %p2965_p4 = pnand %p2964_p0, %p2958_p9 }
  0xea   : > { %2968 = shalt.err (!%p2965_p4)
}
  0xeb   : > { %2599 = dma.hbm_to_vmem [thread:$0]  (!%p4525_p12), %s3801_s24, 512, %s3805_s9, %s4464_s13, %s4466_s7, %s4466_s7, %s4468_s3  }
  0xec   : > { %s2319_s6 = sadd.s32 4294967294, %s3353_s21   ;;  %p64_p10 = scmp.eq.s32.totalorder %s3555_s12, 0 }
  0xed   : > { %s66_s10 = sadd.s32 1, %s3333_s16  ;;  %p73_p7 = scmp.ne.s32.totalorder %s3333_s16, %s3329_s15 }
  0xee   : > { %p79_p2 = scmp.ne.s32.totalorder %s3329_s15, %s3325_s14  ;;  %p4531_p5 = scmp.eq.s32.totalorder %s3353_s21, 0 }
  0xef   : > { %s3842_s18 = scalar_select %p64_p10, %s3333_s16, %s66_s10  }
  0xf0   : > { %p75_p1 = por %p4531_p5, %p73_p7  ;;  %p4532_p8 = scmp.eq.s32.totalorder %s3524_s22, 0 }
  0xf1   : > { %4530 = sst [smem:[#allocation53_spill]] %s3842_s18  ;;  %p417_p9 = scmp.eq.s32.totalorder %s3524_s22, 3 }
  0xf2   : > { %p3848_p11 = por %p4532_p8, %p79_p2  ;;  %p423_p3 = scmp.eq.s32.totalorder %s2319_s6, 3 }
  0xf3   : > { %s443_s26 = sand.u32 1, %s3333_s16   ;;  %s2323_s9 = sshll.u32 %s3349_s20, 6 }
  0xf4   : > { %s4533_s1 = scalar_select %p3848_p11, 1, 0 }
  0xf5   : > { %p3855_p6 = por %p417_p9, %p73_p7  ;;  %p3859_p0 = por %p423_p3, %p79_p2 }
  0xf6   : > { %s2322_s17 = sshll.u32 %s443_s26, 2  ;;  %s4537_s0 = sld [smem:[#allocation55_spill]] }
  0xf7   : > { %s4534_s12 = scalar_select %p3855_p6, 1, 0 }
  0xf8   : > { %s4535_s24 = scalar_select %p3859_p0, 1, 0 }
  0xf9   : > { %s447_s6 = scalar_lea.vmem [#allocation5], %s2322_s17  ;;  %p4538_p4 = scmp.lt.s32.totalorder %s3353_s21, 4 }
  0xfa   : > { %4536 = sst [smem:[#allocation54_spill]] %s4535_s24  ;;  %s454_s13 = sshll.u32 %s447_s6, 4  ;;  %s3874_s13 = int_to_ptr.vmem [resolvable:$true] %s454_s13 }
  0xfb   : > { %p3870_p10 = pnand %p4538_p4, %p75_p1  ;;  %s4540_s30 = sld [smem:[#allocation57_spill]] }
  0xfc   : > { %s3866_s10 = scalar_lea.hbm %s4537_s0, %s2323_s9  ;;  %s444_s28 = scalar_lea.sflag [#allocation6], %s443_s26 }
  0xfd   : > { %s2969_s20 = scalar_lea.hbm %s3866_s10, 64  ;;  %p2971_p2 = pneg %p3870_p10 }
  0xfe   : > { %p2970_p7 = scmp.ne.s32.totalorder %s3866_s10, %s2969_s20  ;;  %s2974_s19 = scalar_lea.hbm %s4537_s0, 128 }
  0xff   : > { %p2975_p8 = scmp.lt.u32.totalorder %s3866_s10, %s4537_s0  ;;  %p2976_p9 = scmp.lt.u32.totalorder %s2974_s19, %s2969_s20 }
 0x100   : > { %p2972_p5 = pnand %p2971_p2, %p2970_p7  ;;  %p2978_p4 = scmp.lt.u32.totalorder %s2969_s20, %s3866_s10 }
 0x101   : > { %s4541_s11 = smov %s4540_s30  ;;  %s3880_s9 = scalar_lea.hbm %s4540_s30, %s3758_s27 }
 0x102   : > { %p2973_p1 = pneg %p2972_p5  ;;  %p2977_p3 = por %p2976_p9, %p2975_p8 }
 0x104   : > { %p2979_p0 = por %p2978_p4, %p2977_p3 }
 0x106   : > { %p2980_p6 = pnand %p2979_p0, %p2973_p1 }
 0x108   : > { %2983 = shalt.err (!%p2980_p6)
}
 0x109   : > { %s2984_s7 = scalar_lea.vmem %s3874_s13, 64  ;;  %s3363_s3 = smov [#allocation5]  }
 0x10a   : > { %p2985_p7 = scmp.ne.s32.totalorder %s3874_s13, %s2984_s7  ;;  %s2989_s26 = sshll.u32 %s3363_s3, 4  ;;  %s2990_s26 = int_to_ptr.vmem [resolvable:$false] %s2989_s26 }
 0x10b   : > { %s2991_s16 = scalar_lea.vmem %s2990_s26, 128  ;;  %p2992_p12 = scmp.lt.s32.totalorder %s3874_s13, %s2990_s26 }
 0x10c   : > { %p2987_p5 = pnand %p2985_p7, %p2971_p2  ;;  %p2993_p8 = scmp.lt.s32.totalorder %s2991_s16, %s2984_s7 }
 0x10e   : > { %p2988_p11 = pneg %p2987_p5  ;;  %p2994_p9 = por %p2993_p8, %p2992_p12 }
 0x110   : > { %p2995_p3 = pnand %p2994_p9, %p2988_p11 }
 0x112   : > { %2998 = shalt.err (!%p2995_p3)
}
 0x113   : > { %2566 = dma.hbm_to_vmem [thread:$0]  (!%p3870_p10), %s3866_s10, 64, %s3874_s13, %s444_s28  }
 0x114   : > { %s485_s19 = scalar_lea.vmem [#allocation10], %s3731_s2  ;;  %s4542_s17 = sld [smem:[#allocation59_spill]] }
 0x115   : > { %s492_s20 = sshll.u32 %s485_s19, 4  ;;  %s2999_s5 = scalar_lea.hbm %s3880_s9, 256  ;;  %s3908_s20 = int_to_ptr.vmem [resolvable:$true] %s492_s20 }
 0x116   : > { %p3000_p12 = scmp.ne.s32.totalorder %s3880_s9, %s2999_s5  ;;  %s3004_s16 = scalar_lea.hbm %s4541_s11, 512 }
 0x117   : > { %p3005_p0 = scmp.lt.u32.totalorder %s3880_s9, %s4541_s11  ;;  %p3006_p10 = scmp.lt.u32.totalorder %s3004_s16, %s2999_s5 }
 0x118   : > { %p3002_p11 = pnand %p3000_p12, %p3669_p13  ;;  %p3008_p1 = scmp.lt.u32.totalorder %s2999_s5, %s3880_s9 }
 0x119   : > { %p3007_p2 = por %p3006_p10, %p3005_p0 }
 0x11a   : > { %s4543_s6 = smov %s4542_s17  ;;  %s3914_s7 = scalar_lea.hbm %s4542_s17, %s3653_s29 }
 0x11b   : > { %p3003_p6 = pneg %p3002_p11  ;;  %p3009_p4 = por %p3008_p1, %p3007_p2 }
 0x11d   : > { %p3010_p7 = pnand %p3009_p4, %p3003_p6 }
 0x11f   : > { %3013 = shalt.err (!%p3010_p7)
}
 0x120   : > { %s3014_s10 = scalar_lea.vmem %s3908_s20, 256  ;;  %s3364_s28 = smov [#allocation10]  }
 0x121   : > { %p3015_p5 = scmp.ne.s32.totalorder %s3908_s20, %s3014_s10  ;;  %s3019_s19 = sshll.u32 %s3364_s28, 4  ;;  %s3020_s19 = int_to_ptr.vmem [resolvable:$false] %s3019_s19 }
 0x122   : > { %s3021_s0 = scalar_lea.vmem %s3020_s19, 512  ;;  %p3022_p3 = scmp.lt.s32.totalorder %s3908_s20, %s3020_s19 }
 0x123   : > { %p3017_p8 = pnand %p3015_p5, %p3669_p13  ;;  %p3023_p12 = scmp.lt.s32.totalorder %s3021_s0, %s3014_s10 }
 0x125   : > { %p3018_p9 = pneg %p3017_p8  ;;  %p3024_p11 = por %p3023_p12, %p3022_p3 }
 0x127   : > { %p3025_p0 = pnand %p3024_p11, %p3018_p9 }
 0x129   : > { %3028 = shalt.err (!%p3025_p0)
}
 0x12a   : > { %p4544_p6 = scmp.ne.s32.totalorder %s4516_s8, 0  ;;  %s4545_s18 = smov 4  }
 0x12b   : > { %s4546_s30 = smov 64   ;;  %s4547_s17 = scalar_lea.sflag [#allocation9], %s3583_s25 }
 0x12c   : > { %2572 = dma.hbm_to_vmem [thread:$0]  (!%p4544_p6), %s3880_s9, 256, %s3908_s20, %s4547_s17, %s4546_s30, %s4546_s30, %s4545_s18  }
 0x12d   : > { %s522_s5 = scalar_lea.vmem [#allocation13], %s3650_s23  ;;  %s4548_s13 = sld [smem:[#allocation61_spill]] }
 0x12e   : > { %s529_s3 = sshll.u32 %s522_s5, 4  ;;  %s3029_s28 = scalar_lea.hbm %s3914_s7, 16  ;;  %s530_s3 = int_to_ptr.vmem [resolvable:$true] %s529_s3 }
 0x12f   : > { %p3030_p10 = scmp.ne.s32.totalorder %s3914_s7, %s3029_s28  ;;  %s3034_s11 = scalar_lea.hbm %s4543_s6, 32 }
 0x130   : > { %p3035_p4 = scmp.lt.u32.totalorder %s3914_s7, %s4543_s6  ;;  %p3036_p7 = scmp.lt.u32.totalorder %s3034_s11, %s3029_s28 }
 0x131   : > { %p3032_p2 = pnand %p3030_p10, %p3669_p13  ;;  %p3038_p8 = scmp.lt.u32.totalorder %s3029_s28, %s3914_s7 }
 0x132   : > { %p3037_p5 = por %p3036_p7, %p3035_p4 }
 0x133   : > { %s3947_s10 = scalar_lea.hbm %s4548_s13, %s3758_s27  ;;  %p3033_p1 = pneg %p3032_p2 }
 0x134   : > { %p3039_p9 = por %p3038_p8, %p3037_p5 }
 0x136   : > { %p3040_p3 = pnand %p3039_p9, %p3033_p1 }
 0x138   : > { %3043 = shalt.err (!%p3040_p3)
}
 0x139   : > { %s3044_s27 = scalar_lea.vmem %s530_s3, 16  ;;  %s3365_s9 = smov [#allocation13]  }
 0x13a   : > { %p3045_p12 = scmp.ne.s32.totalorder %s530_s3, %s3044_s27  ;;  %s3049_s20 = sshll.u32 %s3365_s9, 4  ;;  %s3050_s20 = int_to_ptr.vmem [resolvable:$false] %s3049_s20 }
 0x13b   : > { %s3051_s17 = scalar_lea.vmem %s3050_s20, 32  ;;  %p3052_p10 = scmp.lt.s32.totalorder %s530_s3, %s3050_s20 }
 0x13c   : > { %p3047_p11 = pnand %p3045_p12, %p3669_p13  ;;  %p3053_p2 = scmp.lt.s32.totalorder %s3051_s17, %s3044_s27 }
 0x13e   : > { %p3048_p0 = pneg %p3047_p11  ;;  %p3054_p6 = por %p3053_p2, %p3052_p10 }
 0x140   : > { %p3055_p4 = pnand %p3054_p6, %p3048_p0 }
 0x142   : > { %3058 = shalt.err (!%p3055_p4)
}
 0x143   : > { %p4549_p7 = scmp.ne.s32.totalorder %s4516_s8, 0  ;;  %s4550_s11 = scalar_lea.sflag [#allocation12], %s3583_s25 }
 0x144   : > { %s557_s14 = scalar_lea.vmem [#allocation16], %s3731_s2  ;;  %s4551_s16 = sld [smem:[#allocation63_spill]] }
 0x145   : > { %2578 = dma.hbm_to_vmem [thread:$0]  (!%p4549_p7), %s3914_s7, 16, %s530_s3, %s4550_s11  }
 0x146   : > { %s564_s24 = sshll.u32 %s557_s14, 4  ;;  %s3059_s19 = scalar_lea.hbm %s3947_s10, 256  ;;  %s3969_s24 = int_to_ptr.vmem [resolvable:$true] %s564_s24 }
 0x147   : > { %p3060_p6 = scmp.ne.s32.totalorder %s3947_s10, %s3059_s19  ;;  %s3064_s20 = scalar_lea.hbm %s4548_s13, 512 }
 0x148   : > { %p3065_p8 = scmp.lt.u32.totalorder %s3947_s10, %s4548_s13  ;;  %p3066_p9 = scmp.lt.u32.totalorder %s3064_s20, %s3059_s19 }
 0x149   : > { %p3062_p1 = pnand %p3060_p6, %p3669_p13  ;;  %p3068_p12 = scmp.lt.u32.totalorder %s3059_s19, %s3947_s10 }
 0x14a   : > { %s4552_s0 = smov %s4551_s16  ;;  %s3975_s28 = scalar_lea.hbm %s4551_s16, %s3653_s29 }
 0x14b   : > { %p3063_p5 = pneg %p3062_p1  ;;  %p3067_p3 = por %p3066_p9, %p3065_p8 }
 0x14d   : > { %p3069_p11 = por %p3068_p12, %p3067_p3 }
 0x14f   : > { %p3070_p0 = pnand %p3069_p11, %p3063_p5 }
 0x151   : > { %3073 = shalt.err (!%p3070_p0)
}
 0x152   : > { %s3074_s2 = scalar_lea.vmem %s3969_s24, 256  ;;  %s3366_s3 = smov [#allocation16]  }
 0x153   : > { %p3075_p10 = scmp.ne.s32.totalorder %s3969_s24, %s3074_s2  ;;  %s3079_s11 = sshll.u32 %s3366_s3, 4  ;;  %s3080_s11 = int_to_ptr.vmem [resolvable:$false] %s3079_s11 }
 0x154   : > { %s3081_s14 = scalar_lea.vmem %s3080_s11, 512  ;;  %p3082_p6 = scmp.lt.s32.totalorder %s3969_s24, %s3080_s11 }
 0x155   : > { %p3077_p2 = pnand %p3075_p10, %p3669_p13  ;;  %p3083_p1 = scmp.lt.s32.totalorder %s3081_s14, %s3074_s2 }
 0x157   : > { %p3078_p4 = pneg %p3077_p2  ;;  %p3084_p8 = por %p3083_p1, %p3082_p6 }
 0x159   : > { %p3085_p9 = pnand %p3084_p8, %p3078_p4 }
 0x15b   : > { %3088 = shalt.err (!%p3085_p9)
}
 0x15c   : > { %s4553_s5 = scalar_lea.sflag [#allocation15], %s3583_s25  ;;  %s594_s26 = scalar_lea.vmem [#allocation19], %s3650_s23 }
 0x15d   : > { %2584 = dma.hbm_to_vmem [thread:$0]  (!%p4549_p7), %s3947_s10, 256, %s3969_s24, %s4553_s5, %s4546_s30, %s4546_s30, %s4545_s18  }
 0x15e   : > { %s601_s16 = sshll.u32 %s594_s26, 4  ;;  %s4554_s9 = sld [smem:[#allocation65_spill]]  ;;  %s602_s16 = int_to_ptr.vmem [resolvable:$true] %s601_s16 }
 0x15f   : > { %s3089_s17 = scalar_lea.hbm %s3975_s28, 16  ;;  %s3094_s3 = scalar_lea.hbm %s4552_s0, 32 }
 0x160   : > { %p3090_p5 = scmp.ne.s32.totalorder %s3975_s28, %s3089_s17  ;;  %p3095_p11 = scmp.lt.u32.totalorder %s3975_s28, %s4552_s0 }
 0x161   : > { %p3096_p0 = scmp.lt.u32.totalorder %s3094_s3, %s3089_s17  ;;  %p3098_p2 = scmp.lt.u32.totalorder %s3089_s17, %s3975_s28 }
 0x162   : > { %p3092_p3 = pnand %p3090_p5, %p3669_p13 }
 0x163   : > { %p3097_p10 = por %p3096_p0, %p3095_p11 }
 0x164   : > { %s4008_s20 = scalar_lea.hbm %s4554_s9, %s3653_s29  ;;  %p3093_p12 = pneg %p3092_p3 }
 0x165   : > { %p3099_p4 = por %p3098_p2, %p3097_p10 }
 0x167   : > { %p3100_p6 = pnand %p3099_p4, %p3093_p12 }
 0x169   : > { %3103 = shalt.err (!%p3100_p6)
}
 0x16a   : > { %s3104_s18 = scalar_lea.vmem %s602_s16, 16  ;;  %s3367_s30 = smov [#allocation19]  }
 0x16b   : > { %p3105_p1 = scmp.ne.s32.totalorder %s602_s16, %s3104_s18  ;;  %s3109_s10 = sshll.u32 %s3367_s30, 4  ;;  %s3110_s10 = int_to_ptr.vmem [resolvable:$false] %s3109_s10 }
 0x16c   : > { %s3111_s24 = scalar_lea.vmem %s3110_s10, 32  ;;  %p3112_p5 = scmp.lt.s32.totalorder %s602_s16, %s3110_s10 }
 0x16d   : > { %p3107_p8 = pnand %p3105_p1, %p3669_p13  ;;  %p3113_p3 = scmp.lt.s32.totalorder %s3111_s24, %s3104_s18 }
 0x16f   : > { %p3108_p9 = pneg %p3107_p8  ;;  %p3114_p7 = por %p3113_p3, %p3112_p5 }
 0x171   : > { %p3115_p0 = pnand %p3114_p7, %p3108_p9 }
 0x173   : > { %3118 = shalt.err (!%p3115_p0)
}
 0x174   : > { %p4555_p11 = scmp.ne.s32.totalorder %s4516_s8, 0  ;;  %s4556_s5 = scalar_lea.sflag [#allocation18], %s3583_s25 }
 0x175   : > { %s632_s26 = scalar_lea.vmem [#allocation22], %s3650_s23  ;;  %s4557_s7 = sld [smem:[#allocation67_spill]] }
 0x176   : > { %2590 = dma.hbm_to_vmem [thread:$0]  (!%p4555_p11), %s3975_s28, 16, %s602_s16, %s4556_s5  }
 0x177   : > { %s639_s19 = sshll.u32 %s632_s26, 4  ;;  %s3119_s3 = scalar_lea.hbm %s4008_s20, 16  ;;  %s640_s19 = int_to_ptr.vmem [resolvable:$true] %s639_s19 }
 0x178   : > { %p3120_p7 = scmp.ne.s32.totalorder %s4008_s20, %s3119_s3  ;;  %s3124_s18 = scalar_lea.hbm %s4554_s9, 32 }
 0x179   : > { %p3125_p2 = scmp.lt.u32.totalorder %s4008_s20, %s4554_s9  ;;  %p3126_p4 = scmp.lt.u32.totalorder %s3124_s18, %s3119_s3 }
 0x17a   : > { %p3122_p12 = pnand %p3120_p7, %p3669_p13  ;;  %p3128_p1 = scmp.lt.u32.totalorder %s3119_s3, %s4008_s20 }
 0x17b   : > { %s4034_s2 = scalar_lea.hbm %s4557_s7, %s3653_s29  ;;  %p3127_p6 = por %p3126_p4, %p3125_p2 }
 0x17c   : > { %p3123_p10 = pneg %p3122_p12 }
 0x17d   : > { %p3129_p8 = por %p3128_p1, %p3127_p6 }
 0x17f   : > { %p3130_p9 = pnand %p3129_p8, %p3123_p10 }
 0x181   : > { %3133 = shalt.err (!%p3130_p9)
}
 0x182   : > { %s3134_s29 = scalar_lea.vmem %s640_s19, 16  ;;  %s3368_s28 = smov [#allocation22]  }
 0x183   : > { %p3135_p5 = scmp.ne.s32.totalorder %s640_s19, %s3134_s29  ;;  %s3139_s16 = sshll.u32 %s3368_s28, 4  ;;  %s3140_s16 = int_to_ptr.vmem [resolvable:$false] %s3139_s16 }
 0x184   : > { %s3141_s24 = scalar_lea.vmem %s3140_s16, 32  ;;  %p3142_p7 = scmp.lt.s32.totalorder %s640_s19, %s3140_s16 }
 0x185   : > { %p3137_p3 = pnand %p3135_p5, %p3669_p13  ;;  %p3143_p12 = scmp.lt.s32.totalorder %s3141_s24, %s3134_s29 }
 0x187   : > { %p3138_p0 = pneg %p3137_p3  ;;  %p3144_p11 = por %p3143_p12, %p3142_p7 }
 0x189   : > { %p3145_p2 = pnand %p3144_p11, %p3138_p0 }
 0x18b   : > { %3148 = shalt.err (!%p3145_p2)
}
 0x18c   : > { %p4558_p4 = scmp.ne.s32.totalorder %s4516_s8, 0  ;;  %s4559_s5 = scalar_lea.sflag [#allocation21], %s3583_s25 }
 0x18d   : > { %s670_s26 = scalar_lea.vmem [#allocation25], %s3650_s23  ;;  %s3149_s17 = scalar_lea.hbm %s4034_s2, 16 }
 0x18e   : > { %2596 = dma.hbm_to_vmem [thread:$0]  (!%p4558_p4), %s4008_s20, 16, %s640_s19, %s4559_s5  }
 0x18f   : > { %s677_s27 = sshll.u32 %s670_s26, 4  ;;  %p3150_p10 = scmp.ne.s32.totalorder %s4034_s2, %s3149_s17  ;;  %s678_s27 = int_to_ptr.vmem [resolvable:$true] %s677_s27 }
 0x190   : > { %s3154_s14 = scalar_lea.hbm %s4557_s7, 32  ;;  %p3155_p1 = scmp.lt.u32.totalorder %s4034_s2, %s4557_s7 }
 0x191   : > { %p3152_p11 = pnand %p3150_p10, %p3669_p13  ;;  %p3156_p8 = scmp.lt.u32.totalorder %s3154_s14, %s3149_s17 }
 0x192   : > { %p3158_p5 = scmp.lt.u32.totalorder %s3149_s17, %s4034_s2 }
 0x193   : > { %p3153_p6 = pneg %p3152_p11  ;;  %p3157_p9 = por %p3156_p8, %p3155_p1 }
 0x195   : > { %p3159_p3 = por %p3158_p5, %p3157_p9 }
 0x197   : > { %p3160_p0 = pnand %p3159_p3, %p3153_p6 }
 0x199   : > { %3163 = shalt.err (!%p3160_p0)
}
 0x19a   : > { %s3164_s23 = scalar_lea.vmem %s678_s27, 16  ;;  %s3369_s20 = smov [#allocation25]  }
 0x19b   : > { %p3165_p7 = scmp.ne.s32.totalorder %s678_s27, %s3164_s23  ;;  %s3169_s19 = sshll.u32 %s3369_s20, 4  ;;  %s3170_s19 = int_to_ptr.vmem [resolvable:$false] %s3169_s19 }
 0x19c   : > { %s3171_s10 = scalar_lea.vmem %s3170_s19, 32  ;;  %p3172_p10 = scmp.lt.s32.totalorder %s678_s27, %s3170_s19 }
 0x19d   : > { %p3167_p12 = pnand %p3165_p7, %p3669_p13  ;;  %p3173_p11 = scmp.lt.s32.totalorder %s3171_s10, %s3164_s23 }
 0x19f   : > { %p3168_p2 = pneg %p3167_p12  ;;  %p3174_p4 = por %p3173_p11, %p3172_p10 }
 0x1a1   : > { %p3175_p1 = pnand %p3174_p4, %p3168_p2 }
 0x1a3   : > { %3178 = shalt.err (!%p3175_p1)
}
 0x1a4   : > { %p4560_p8 = scmp.ne.s32.totalorder %s4516_s8, 0  ;;  %s4561_s29 = scalar_lea.sflag [#allocation24], %s3583_s25 }
 0x1a5   : > { %s4562_s28 = sld [smem:[#allocation52_spill]] }
 0x1a6   : > { %2602 = dma.hbm_to_vmem [thread:$0]  (!%p4560_p8), %s4034_s2, 16, %s678_s27, %s4561_s29  }
 0x1ab   : > { %p4563_p6 = scmp.ne.s32.totalorder %s4562_s28, 0 }
 0x1ac   : > { %s4078_s4 = sand.u32 (!%p4563_p6), 1, %s3329_s15   ;;  %p4564_p13 = scmp.ne.s32.totalorder (!%p4563_p6), %s4533_s1, 0 }
 0x1ad   : > { %686 = sbr.rel (%p4563_p6) target bundleno = 3246 (0xcae), region = 72  ;;  %s2347_s16 = sshll.u32 (!%p4563_p6), %s4078_s4, 2 }
 0x1ae   : > { %s689_s24 = scalar_lea.sflag (!%p4563_p6), [#allocation6], %s4078_s4  ;;  %s4082_s5 = scalar_lea.vmem (!%p4563_p6), [#allocation5], %s2347_s16 }
 0x1b4   : > { %3264 = dma.done.wait (%p4564_p13), %s689_s24, 64  }
 0x1b5   : > { %3266 = vsyncadd (%p4564_p13), %s689_s24, 4294967232  ;;  %s4565_s25 = sld [smem:[#allocation38_spill]]  ;;  %s4566_s8 = sld [smem:[#allocation48_spill]] }
 0x1b6   : > { %s4089_s2 = sand.u32 1, %s3524_s22  }
 0x1b7   : > { %s698_s17 = scalar_lea.sflag [#allocation9], %s4089_s2 }
 0x1bb   : > { %s699_s26 = sand.u32 1, %s4565_s25   ;;  %p4567_p4 = scmp.ne.s32.totalorder %s4566_s8, 0 }
 0x1bc   : > { %s4092_s27 = sshll.u32 %s699_s26, 3 }
 0x1bd   : > { %s701_s3 = scalar_lea.vmem [#allocation8], %s4092_s27 }
 0x1be   : > { %3268 = dma.done.wait (%p4567_p4), %s698_s17, 128  }
 0x1bf   : > { %3270 = vsyncadd (%p4567_p4), %s698_s17, 4294967168  ;;  %s4568_s11 = sld [smem:[#allocation36_spill]] }
 0x1c0   : > { %s4569_s1 = sld [smem:[#allocation51_spill]] }
 0x1c5   : > { %s4101_s14 = sand.u32 1, %s4568_s11  }
 0x1c6   : > { %s4104_s18 = sshll.u32 %s4101_s14, 4  ;;  %p4570_p9 = scmp.ne.s32.totalorder %s4569_s1, 0 }
 0x1c7   : > { %s710_s22 = scalar_lea.vmem [#allocation10], %s4104_s18 }
 0x1c8   : > { %3272 = dma.done.wait (%p4570_p9), %s698_s17, 256  }
 0x1c9   : > { %3274 = vsyncadd (%p4570_p9), %s698_s17, 4294967040  ;;  %s716_s30 = scalar_lea.sflag [#allocation12], %s4089_s2  ;;  %s718_s23 = scalar_lea.vmem [#allocation11], %s4101_s14 }
 0x1ca   : > { %3276 = dma.done.wait (%p4570_p9), %s716_s30, 32  }
 0x1cb   : > { %3278 = vsyncadd (%p4570_p9), %s716_s30, 4294967264  ;;  %s726_s20 = scalar_lea.vmem [#allocation13], %s4101_s14  ;;  %s732_s19 = scalar_lea.sflag [#allocation15], %s4089_s2 }
 0x1cc   : > { %s734_s10 = scalar_lea.vmem [#allocation14], %s4101_s14 }
 0x1cd   : > { %3280 = dma.done.wait (%p4570_p9), %s732_s19, 272  }
 0x1ce   : > { %3282 = vsyncadd (%p4570_p9), %s732_s19, 4294967024  ;;  %s4125_s29 = scalar_lea.vmem [#allocation16], %s4104_s18  ;;  %s749_s28 = scalar_lea.sflag [#allocation18], %s4089_s2 }
 0x1cf   : > { %s751_s16 = scalar_lea.vmem [#allocation17], %s4101_s14 }
 0x1d0   : > { %3284 = dma.done.wait (%p4570_p9), %s749_s28, 32  }
 0x1d1   : > { %3286 = vsyncadd (%p4570_p9), %s749_s28, 4294967264  ;;  %s759_s24 = scalar_lea.vmem [#allocation19], %s4101_s14  ;;  %s765_s25 = scalar_lea.sflag [#allocation21], %s4089_s2 }
 0x1d2   : > { %3288 = dma.done.wait (%p4570_p9), %s765_s25, 272  }
 0x1d3   : > { %3290 = vsyncadd (%p4570_p9), %s765_s25, 4294967024  ;;  %s2352_s26 = sshll.u32 %s4101_s14, 5  ;;  %s776_s17 = scalar_lea.vmem [#allocation22], %s4101_s14 }
 0x1d4   : > { %s782_s11 = scalar_lea.sflag [#allocation24], %s4089_s2  ;;  %s4143_s30 = scalar_lea.vmem [#allocation23], %s2352_s26 }
 0x1d5   : > { %3292 = dma.done.wait (%p4570_p9), %s782_s11, 528  }
 0x1d6   : > { %3294 = vsyncadd (%p4570_p9), %s782_s11, 4294966768  ;;  %s2353_s19 = sshll.u32 %s4078_s4, 3  ;;  %s793_s28 = scalar_lea.vmem [#allocation25], %s4101_s14 }
 0x1d7   : > { %s4151_s8 = scalar_lea.vmem [#allocation26], %s2353_s19  ;;  %s4571_s25 = sld [smem:[#allocation42_spill]] }
 0x1dd   : > { %p2354_p5 = scmp.ne.s32.totalorder %s4571_s25, 0 }
 0x1de   : > { %v894_v0 = vld [vmem:[%s4082_s5] sm:$0xf] (!%p2354_p5)  ;;  %vm896_vm0 = vcmask (!%p2354_p5), 261120  }
 0x1df   : > { %893 = sbr.rel (%p2354_p5) target bundleno = 486 (0x1e6), region = 128  ;;  %v895_v1 = vunpack.c.l.bf16 (!%p2354_p5), %v894_v0 }
 0x1e1   : > { %897 = vst.msk [vmem:[%s4151_s8] sm:$0xff] (!%p2354_p5), %vm896_vm0, %v895_v1 }
 0x1e6 PF: > { %vm927_vm1 = vcmask 261120   ;;  %v2737_v9 = vld [vmem:[%s710_s22] sm:$0xff]   ;;  %v3370_v10 = vmov 0.0   ;;  %vm3371_vm2 = vmmov 0   ;;  %v2738_v11 = vld [vmem:[%s710_s22 + $0x8] sm:$0xff]   ;;  %v942_v14 = vlaneseq  ;;  %s3372_s5 = smov 96  }
 0x1e7   : > { %2435 = vmatprep.subr.bf16.mxu1 %v3370_v10  ;;  %2439 = vmatprep.mubr.msk.bf16.mxu1 %vm3371_vm2, %v3370_v10  ;;  %v4180_v18 = vld [vmem:[%s701_s3] sm:$0x3f]  ;;  %s3373_s2 = smov 32   ;;  %vm1064_vm5 = vcmask 60416   ;;  %s3374_s27 = smov 120   ;;  %vm1142_vm8 = vcmask 64512  }
 0x1e8   : > { %v4157_v2 = vld [vmem:[%s4151_s8] sm:$0xff]  ;;  %2436 = vmatpush3.bf16.msra.mxu1 %v2737_v9  ;;  %2449 = vmatprep.subr.bf16.mxu0 %v3370_v10  ;;  %v4175_v16 = vshrl.u32 %v942_v14, 7  ;;  %s3375_s3 = smov 64   ;;  %s3376_s1 = smov 88   ;;  %vm1390_vm9 = vcmask 1043456   ;;  %vm1933_vm12 = vcmask 523264  }
 0x1e9   : > { %v928_v3 = vsel %vm927_vm1, %v4157_v2, 0.0  ;;  %2437 = vmatprep.subr.bf16.mxu1 %v3370_v10  ;;  %2451 = vmatprep.mubr.msk.bf16.mxu0 %vm3371_vm2, %v3370_v10  ;;  %v2355_v27 = vld [vmem:[%s718_s23] ss:$0 sm:$0xff]  ;;  %s3377_s22 = smov 80   ;;  %s3378_s23 = smov 72  }
 0x1ea   : > { %929 = vadd.xlane.f32.xlu0 %v928_v3  ;;  %v944_v17 = vsub.s32 0, %v4175_v16  ;;  %v949_v19 = vsub.s32 1, %v4175_v16  ;;  %v2360_v35 = vld [vmem:[%s734_s10] ss:$0 sm:$0xff]  ;;  %s3380_s10 = smov 104   ;;  %s3381_s26 = smov 48  }
 0x1eb   : > { %v2359_v46 = vld [vmem:[%s726_s20] ss:$0 sm:$0xff]  ;;  %s3379_s20 = smov 112   ;;  %s3382_s11 = smov 40  }
 0x1ec   : > { %2438 = vmatpush3.bf16.msra.mxu1 %v2738_v11  ;;  %v945_v20 = vrot.slane %v4180_v18, %v944_v17  ;;  %v950_v23 = vrot.slane %v4180_v18, %v949_v19  ;;  %s3383_s19 = smov 56   ;;  %s1985_s14 = scalar_lea.sflag [#allocation7], %s4078_s4 }
 0x1ed   : > { %2443 = vmatprep.subr.bf16.mxu1 %v3370_v10  ;;  %p4576_p0 = scmp.ne.s32.totalorder %s4534_s12, 0 }
 0x277   : > { %v930_v4 = vpop.xlane.xlu0 %929 }
 0x278   : > { %v932_v5 = vmul.f32 0.03125, %v930_v4 }
 0x27a   : > { %v933_v6 = vsub.f32 %v4157_v2, %v932_v5 }
 0x27c   : > { %v934_v7 = vmul.f32 %v933_v6, %v933_v6 }
 0x27e   : > { %v935_v8 = vsel %vm927_vm1, %v934_v7, 0.0 }
 0x27f   : > { %936 = vadd.xlane.f32.xlu0 %v935_v8 }
 0x30c   : > { %v937_v12 = vpop.xlane.xlu0 %936 }
 0x30d   : > { %v938_v13 = vmul.f32 0.03125, %v937_v12 }
 0x30f   : > { %v939_v15 = vadd.f32 1e-06, %v938_v13 }
 0x311   : > { %2745 = vrsqrt.f32 %v939_v15 }
 0x31b   : > { %v2746_v21 = vpop.eup %2745 }
 0x31c   : > { %v941_v22 = vmul.f32 %v2746_v21, %v933_v6 }
 0x31e   : > { %v946_v24 = vmul.f32 %v945_v20, %v941_v22 }
 0x320   : > { %v951_v25 = vadd.f32 %v950_v23, %v946_v24 }
 0x322   : > { %v952_v26 = vpack.c.bf16 %v951_v25, %v951_v25 }
 0x324   : > { %2440 = vmatmul.mubr.msk.bf16.vlgmr.msra.gmra.mrb[0].mxu1 %vm927_vm1, %v952_v26 }
 0x325   : > { %2445 = vmatprep.mubr.msk.bf16.mxu1 %vm3371_vm2, %v3370_v10 }
 0x3f7   : > { %v1008_v28 = vpop.f32.mrb[0].mxu1 }
 0x3f8   : > { %v1009_v29 = vadd.f32 %v2355_v27, %v1008_v28  ;;  %v2441_v30 = vpop.f32.mrb[1].mxu1 }
 0x3f9   : > { %v1011_v31 = vpop.f32.mrb[2].mxu1 }
 0x3fa   : > { %v2442_v32 = vpop.f32.mrb[3].mxu1  ;;  %v1014_v33 = vmul.f32 %v1009_v29, %v1009_v29  ;;  %v4198_v51 = vpack.c.bf16 %v1009_v29, %v1009_v29 }
 0x3fc   : > { %1037 = vrot.lane.b32.xlu1 %v1014_v33, %s3372_s5  ;;  %v1015_v34 = vsel %vm927_vm1, %v1014_v33, 0.0 }
 0x3fd   : > { %1016 = vadd.xlane.f32.xlu0 %v1015_v34 }
 0x413   : > { %1058 = vrot.lane.b32.xlu0 %v2360_v35, %s3373_s2 }
 0x46e   : > { %v1038_v36 = vpop.permute.xlu1 %1037 }
 0x46f   : > { %v1040_v37 = vsel %vm927_vm1, %v1038_v36, 0.0 }
 0x470   : > { %1041 = vadd.xlane.f32.xlu1 %v1040_v37 }
 0x48a   : > { %v1017_v38 = vpop.xlane.xlu0 %1016 }
 0x48b   : > { %2747 = vrsqrt.f32 %v1017_v38  ;;  %vm1020_vm3 = vcmp.eq.f32.partialorder %v1017_v38, inf  ;;  %v1023_v41 = vand.u32 2147483648, %v1017_v38  ;;  %vm1022_vm4 = vcmp.eq.f32.partialorder %v1017_v38, 0.0 }
 0x48e   : > { %v1059_v60 = vpop.permute.xlu0 %1058 }
 0x495   : > { %v2748_v39 = vpop.eup %2747 }
 0x496   : > { %v1019_v40 = vmul.f32 %v2748_v39, %v1017_v38 }
 0x498   : > { %v1021_v42 = vsel %vm1020_vm3, %v1017_v38, %v1019_v40 }
 0x499   : > { %v1024_v43 = vsel %vm1022_vm4, %v1023_v41, %v1021_v42 }
 0x49a   : > { %v1025_v44 = vmax.f32 %v1024_v43, 1e-12 }
 0x49c   : > { %2749 = vrcp.f32 %v1025_v44 }
 0x4a6   : > { %v2750_v45 = vpop.eup %2749 }
 0x4a7   : > { %v1027_v47 = vmul.f32 %v2750_v45, %v1009_v29 }
 0x4a9   : > { %v1034_v48 = vmul.f32 %v2359_v46, %v1027_v47 }
 0x4ab   : > { %v1035_v49 = vmul.f32 5.656854, %v1034_v48 }
 0x4ad   : > { %v1063_v50 = vpack.c.bf16 %v1035_v49, %v1035_v49 }
 0x4af   : > { %1085 = vrot.lane.b32.xlu1 %v1063_v50, %s3374_s27  ;;  %1065 = vst.msk [vmem:[#allocation2] sm:$0xf] %vm1064_vm5, %v1063_v50  ;;  %s3384_s27 = smov [#allocation26]  }
 0x4b3   : > { %1078 = vrot.lane.b32.xlu1 %v4198_v51, %s3375_s3  ;;  %s3183_s3 = sshll.u32 %s3384_s27, 4  ;;  %s3184_s3 = int_to_ptr.vmem [resolvable:$false] %s3183_s3 }
 0x4b6   : > { %v1130_v14 = vld [vmem:[#allocation2] sm:$0xf] }
 0x4fd   : > { %v1042_v52 = vpop.xlane.xlu1 %1041 }
 0x4fe   : > { %2751 = vrsqrt.f32 %v1042_v52  ;;  %vm1045_vm6 = vcmp.eq.f32.partialorder %v1042_v52, inf  ;;  %v1048_v55 = vand.u32 2147483648, %v1042_v52  ;;  %vm1047_vm7 = vcmp.eq.f32.partialorder %v1042_v52, 0.0 }
 0x508   : > { %v2752_v53 = vpop.eup %2751 }
 0x509   : > { %v1044_v54 = vmul.f32 %v2752_v53, %v1042_v52 }
 0x50b   : > { %v1046_v56 = vsel %vm1045_vm6, %v1042_v52, %v1044_v54 }
 0x50c   : > { %v1049_v57 = vsel %vm1047_vm7, %v1048_v55, %v1046_v56 }
 0x50d   : > { %v1050_v58 = vmax.f32 %v1049_v57, 1e-12 }
 0x50f   : > { %2753 = vrcp.f32 %v1050_v58 }
 0x519   : > { %v2754_v59 = vpop.eup %2753 }
 0x51a   : > { %v1052_v61 = vmul.f32 %v2754_v59, %v1009_v29 }
 0x51c   : > { %v1061_v62 = vmul.f32 %v1059_v60, %v1052_v61 }
 0x51e   : > { %v1062_v63 = vmul.f32 5.656854, %v1061_v62 }
 0x520   : > { %v2397_v0 = vpack.c.bf16 %v1062_v63, %v1062_v63 }
 0x521   : > { %v1086_v1 = vpop.permute.xlu1 %1085 }
 0x522   : > { %1089 = vst.msk [vmem:[#allocation2 + $0x4] sm:$0xf] %vm1064_vm5, %v1086_v1  ;;  %1070 = vrot.lane.b32.xlu0 %v2397_v0, %s3372_s5  ;;  %s4575_s5 = sld [smem:[#allocation68_spill]] }
 0x525   : > { %v1079_v3 = vpop.permute.xlu1 %1078 }
 0x526   : > { %1081 = vst.msk [vmem:[#allocation4] sm:$0xf] %vm1064_vm5, %v1079_v3  ;;  %1090 = vrot.lane.b32.xlu0 %v2397_v0, %s3376_s1  ;;  %s3185_s1 = scalar_lea.vmem %s3184_s3, 256 }
 0x529   : > { %v1131_v20 = vld [vmem:[#allocation2 + $0x4] sm:$0xf] }
 0x52a   : > { %1105 = vrot.lane.b32.xlu0 %v2397_v0, %s3377_s22 }
 0x52d   : > { %v1138_v23 = vld [vmem:[#allocation4] sm:$0xf] }
 0x52e   : > { %1120 = vrot.lane.b32.xlu0 %v2397_v0, %s3378_s23  ;;  %v1392_v25 = vsel %vm1390_vm9, %v1138_v23, 0 }
 0x532   : > { %1100 = vrot.lane.b32.xlu0 %v1063_v50, %s3379_s20 }
 0x536   : > { %1115 = vrot.lane.b32.xlu0 %v1063_v50, %s3380_s10 }
 0x594   : > { %v1071_v4 = vpop.permute.xlu0 %1070 }
 0x595   : > { %1073 = vst.msk [vmem:[#allocation3] sm:$0xf] %vm1064_vm5, %v1071_v4 }
 0x598   : > { %v1091_v5 = vpop.permute.xlu0 %1090 }
 0x599   : > { %1094 = vst.msk [vmem:[#allocation3 + $0x4] sm:$0xf] %vm1064_vm5, %v1091_v5 }
 0x59c   : > { %v1106_v6 = vpop.permute.xlu0 %1105  ;;  %v1134_v7 = vld [vmem:[#allocation3] sm:$0xf] }
 0x59d   : > { %1109 = vst.msk [vmem:[#allocation3 + $0x8] sm:$0xf] %vm1064_vm5, %v1106_v6  ;;  %v1147_v8 = vsel %vm1142_vm8, %v1134_v7, 0 }
 0x59e   : > { %2444 = vmatpush3.bf16.xpose.msra.mxu1 %v1147_v8 }
 0x59f   : > { %2455 = vmatprep.subr.bf16.mxu1 %v3370_v10 }
 0x5a0   : > { %v1121_v9 = vpop.permute.xlu0 %1120  ;;  %v1135_v11 = vld [vmem:[#allocation3 + $0x4] sm:$0xf] }
 0x5a1   : > { %1124 = vst.msk [vmem:[#allocation3 + $0xc] sm:$0xf] %vm1064_vm5, %v1121_v9  ;;  %v1193_v12 = vsel %vm1142_vm8, %v1135_v11, 0 }
 0x5a2   : > { %2450 = vmatpush3.bf16.xpose.msra.mxu0 %v1193_v12 }
 0x5a3   : > { %2461 = vmatprep.subr.bf16.mxu0 %v3370_v10 }
 0x5a4   : > { %v1101_v13 = vpop.permute.xlu0 %1100  ;;  %v1136_v15 = vld [vmem:[#allocation3 + $0x8] sm:$0xf] }
 0x5a5   : > { %1104 = vst.msk [vmem:[#allocation2 + $0x8] sm:$0xf] %vm1064_vm5, %v1101_v13  ;;  %2446 = vmatmul.mubr.msk.bf16.vlgmr.msra.gmra.mrb[4].mxu1 %vm1142_vm8, %v1130_v14  ;;  %v1239_v17 = vsel %vm1142_vm8, %v1136_v15, 0 }
 0x5a6   : > { %2456 = vmatpush3.bf16.xpose.msra.mxu1 %v1239_v17  ;;  %2457 = vmatprep.mubr.msk.bf16.mxu1 %vm3371_vm2, %v3370_v10 }
 0x5a7   : > { %2467 = vmatprep.subr.bf16.mxu1 %v3370_v10 }
 0x5a8   : > { %v1116_v19 = vpop.permute.xlu0 %1115  ;;  %v1137_v21 = vld [vmem:[#allocation3 + $0xc] sm:$0xf] }
 0x5a9   : > { %1119 = vst.msk [vmem:[#allocation2 + $0xc] sm:$0xf] %vm1064_vm5, %v1116_v19  ;;  %2452 = vmatmul.mubr.msk.bf16.vlgmr.msra.gmra.mrb[0].mxu0 %vm1142_vm8, %v1131_v20  ;;  %v1285_v22 = vsel %vm1142_vm8, %v1137_v21, 0  ;;  %v906_v20 = vld [vmem:[%s4125_s29] sm:$0xf] }
 0x5aa   : > { %2462 = vmatpush3.bf16.xpose.msra.mxu0 %v1285_v22  ;;  %2463 = vmatprep.mubr.msk.bf16.mxu0 %vm3371_vm2, %v3370_v10  ;;  %v1636_v21 = vsel %vm1390_vm9, %v906_v20, 0  ;;  %v907_v22 = vld [vmem:[%s4125_s29 + $0x4] sm:$0xf] }
 0x5ab   : > { %2473 = vmatprep.subr.bf16.mxu0 %v3370_v10  ;;  %v1590_v23 = vsel %vm1390_vm9, %v907_v22, 0 }
 0x5ac   : > { %v1132_v24 = vld [vmem:[#allocation2 + $0x8] sm:$0xf] }
 0x5ad   : > { %2458 = vmatmul.mubr.msk.bf16.vlgmr.msra.gmra.mrb[8].mxu1 %vm1142_vm8, %v1132_v24 }
 0x5ae   : > { %2468 = vmatpush3.bf16.msra.mxu1 %v1392_v25  ;;  %2469 = vmatprep.mubr.msk.bf16.mxu1 %vm3371_vm2, %v3370_v10 }
 0x5af   : > { %2479 = vmatprep.subr.bf16.mxu1 %v3370_v10 }
 0x5b0   : > { %v1133_v26 = vld [vmem:[#allocation2 + $0xc] sm:$0xf] }
 0x5b1   : > { %2464 = vmatmul.mubr.msk.bf16.vlgmr.msra.gmra.mrb[4].mxu0 %vm1142_vm8, %v1133_v26 }
 0x5b2   : > { %2475 = vmatprep.mubr.msk.bf16.mxu0 %vm3371_vm2, %v3370_v10 }
 0x678   : > { %v1183_v27 = vpop.f32.mrb[4].mxu1 }
 0x679   : > { %v2447_v28 = vpop.f32.mrb[5].mxu1  ;;  %v1327_v29 = vsel %vm1142_vm8, %v1183_v27, -inf }
 0x67a   : > { %1328 = vmax.xlane.f32.xlu1 %v1327_v29  ;;  %v1186_v30 = vpop.f32.mrb[6].mxu1 }
 0x67b   : > { %v2448_v31 = vpop.f32.mrb[7].mxu1 }
 0x67c   : > { %v1229_v32 = vpop.f32.mrb[0].mxu0 }
 0x67d   : > { %v2453_v33 = vpop.f32.mrb[1].mxu0  ;;  %v1330_v34 = vsel %vm1142_vm8, %v1229_v32, -inf }
 0x67e   : > { %1331 = vmax.xlane.f32.xlu0 %v1330_v34  ;;  %v1232_v35 = vpop.f32.mrb[2].mxu0 }
 0x67f   : > { %v2454_v36 = vpop.f32.mrb[3].mxu0 }
 0x680   : > { %v1275_v37 = vpop.f32.mrb[8].mxu1 }
 0x681   : > { %v2459_v38 = vpop.f32.mrb[9].mxu1  ;;  %v1333_v39 = vsel %vm1142_vm8, %v1275_v37, -inf }
 0x682   : > { %1334 = vmax.xlane.f32.xlu0 %v1333_v39  ;;  %v1278_v40 = vpop.f32.mrb[10].mxu1 }
 0x683   : > { %v2460_v41 = vpop.f32.mrb[11].mxu1 }
 0x684   : > { %v1321_v42 = vpop.f32.mrb[4].mxu0 }
 0x685   : > { %v2465_v43 = vpop.f32.mrb[5].mxu0  ;;  %v1336_v44 = vsel %vm1142_vm8, %v1321_v42, -inf }
 0x686   : > { %v1324_v45 = vpop.f32.mrb[6].mxu0  ;;  %1337 = vmax.xlane.f32.xlu0 %v1336_v44 }
 0x687   : > { %v2466_v46 = vpop.f32.mrb[7].mxu0 }
 0x68b   : > { %1110 = vrot.lane.b32.xlu1 %v4198_v51, %s3381_s26 }
 0x68f   : > { %1125 = vrot.lane.b32.xlu1 %v4198_v51, %s3382_s11 }
 0x69c   : > { %1095 = vrot.lane.b32.xlu0 %v4198_v51, %s3383_s19 }
 0x707   : > { %v4239_v47 = vpop.xlane.xlu1 %1328 }
 0x708   : > { %v1351_v48 = vsub.f32 %v1183_v27, %v4239_v47  ;;  %v1339_v24 = vsub.f32 -inf, %v4239_v47 }
 0x70a   : > { %v1355_v49 = vmul.f32 1.442695, %v1351_v48  ;;  %v1343_v25 = vmul.f32 1.442695, %v1339_v24 }
 0x70b   : > { %v4242_v50 = vpop.xlane.xlu0 %1331  ;;  %v1111_v52 = vpop.permute.xlu1 %1110 }
 0x70c   : > { %v1352_v53 = vsub.f32 %v1229_v32, %v4242_v50  ;;  %1114 = vst.msk [vmem:[#allocation4 + $0x8] sm:$0xf] %vm1064_vm5, %v1111_v52  ;;  %2755 = vpow2.f32 %v1355_v49  ;;  %v1340_v27 = vsub.f32 -inf, %v4242_v50  ;;  %v909_v50 = vld [vmem:[%s4125_s29 + $0xc] sm:$0xf] }
 0x70e   : > { %v1357_v54 = vmul.f32 1.442695, %v1352_v53  ;;  %v1345_v29 = vmul.f32 1.442695, %v1340_v27 }
 0x70f   : > { %v1126_v55 = vpop.permute.xlu1 %1125  ;;  %v1335_v56 = vpop.xlane.xlu0 %1334 }
 0x710   : > { %1129 = vst.msk [vmem:[#allocation4 + $0xc] sm:$0xf] %vm1064_vm5, %v1126_v55  ;;  %v1353_v57 = vsub.f32 %v1275_v37, %v1335_v56  ;;  %2757 = vpow2.f32 %v1357_v54  ;;  %v1341_v26 = vsub.f32 -inf, %v1335_v56 }
 0x712   : > { %v1359_v51 = vmul.f32 1.442695, %v1353_v57  ;;  %v1347_v28 = vmul.f32 1.442695, %v1341_v26  ;;  %v1731_v57 = vsel %vm1390_vm9, %v909_v50, 0 }
 0x713   : > { %v4247_v58 = vpop.xlane.xlu0 %1337  ;;  %v1140_v63 = vld [vmem:[#allocation4 + $0x8] sm:$0xf] }
 0x714   : > { %v1354_v59 = vsub.f32 %v1321_v42, %v4247_v58  ;;  %2759 = vpow2.f32 %v1359_v51  ;;  %v1484_v3 = vsel %vm1390_vm9, %v1140_v63, 0  ;;  %v1342_v31 = vsub.f32 -inf, %v4247_v58 }
 0x716   : > { %v1361_v60 = vmul.f32 1.442695, %v1354_v59  ;;  %v2756_v61 = vpop.eup %2755  ;;  %v1349_v34 = vmul.f32 1.442695, %v1342_v31 }
 0x717   : > { %v1096_v62 = vpop.permute.xlu0 %1095  ;;  %v1367_v0 = vsel %vm1142_vm8, %v2756_v61, 0.0  ;;  %v1383_v1 = vpack.c.bf16 %v2756_v61, %v2756_v61  ;;  %v1141_v12 = vld [vmem:[#allocation4 + $0xc] sm:$0xf] }
 0x718   : > { %1099 = vst.msk [vmem:[#allocation4 + $0x4] sm:$0xf] %vm1064_vm5, %v1096_v62  ;;  %2761 = vpow2.f32 %v1361_v60  ;;  %1368 = vadd.xlane.f32.xlu0 %v1367_v0  ;;  %v1530_v17 = vsel %vm1390_vm9, %v1141_v12, 0 }
 0x719   : > { %2470 = vmatmul.mubr.msk.bf16.vlgmr.msra.gmra.mrb[12].mxu1 %vm1142_vm8, %v1383_v1  ;;  %2763 = vpow2.f32 %v1343_v25 }
 0x71a   : > { %v2758_v4 = vpop.eup %2757  ;;  %2480 = vmatpush3.bf16.msra.mxu1 %v1484_v3  ;;  %2481 = vmatprep.mubr.msk.bf16.mxu1 %vm3371_vm2, %v3370_v10  ;;  %2765 = vpow2.f32 %v1347_v28 }
 0x71b   : > { %v1370_v5 = vsel %vm1142_vm8, %v2758_v4, 0.0  ;;  %2491 = vmatprep.subr.bf16.mxu1 %v3370_v10  ;;  %v1384_v13 = vpack.c.bf16 %v2758_v4, %v2758_v4  ;;  %2767 = vpow2.f32 %v1345_v29 }
 0x71c   : > { %1371 = vadd.xlane.f32.xlu1 %v1370_v5  ;;  %2769 = vpow2.f32 %v1349_v34 }
 0x71e   : > { %v2760_v6 = vpop.eup %2759 }
 0x71f   : > { %v1139_v7 = vld [vmem:[#allocation4 + $0x4] sm:$0xf]  ;;  %v1373_v8 = vsel %vm1142_vm8, %v2760_v6, 0.0  ;;  %v1385_v11 = vpack.c.bf16 %v2760_v6, %v2760_v6 }
 0x720   : > { %v1438_v9 = vsel %vm1390_vm9, %v1139_v7, 0  ;;  %1374 = vadd.xlane.f32.xlu0 %v1373_v8  ;;  %v908_v7 = vld [vmem:[%s4125_s29 + $0x8] sm:$0xf]  ;;  %s4572_s29 = scalar_lea.vmem [#allocation20], %s4104_s18  ;;  %s4574_s18 = sld [smem:[#allocation43_spill]] }
 0x721   : > { %2474 = vmatpush3.bf16.msra.mxu0 %v1438_v9  ;;  %2482 = vmatmul.mubr.msk.bf16.vlgmr.msra.gmra.mrb[16].mxu1 %vm1142_vm8, %v1385_v11  ;;  %v1683_v12 = vsel %vm1390_vm9, %v908_v7, 0 }
 0x722   : > { %2485 = vmatprep.subr.bf16.mxu0 %v3370_v10  ;;  %v2762_v14 = vpop.eup %2761  ;;  %2493 = vmatprep.mubr.msk.bf16.mxu1 %vm3371_vm2, %v3370_v10 }
 0x723   : > { %v1376_v15 = vsel %vm1142_vm8, %v2762_v14, 0.0  ;;  %v1386_v19 = vpack.c.bf16 %v2762_v14, %v2762_v14  ;;  %2492 = vmatpush3.bf16.msra.mxu1 %v1590_v23  ;;  %v2764_v30 = vpop.eup %2763 }
 0x724   : > { %2476 = vmatmul.mubr.msk.bf16.vlgmr.msra.gmra.mrb[8].mxu0 %vm1142_vm8, %v1384_v13  ;;  %1377 = vadd.xlane.f32.xlu0 %v1376_v15  ;;  %v1363_v33 = vmul.f32 0.0, %v2764_v30  ;;  %v2766_v36 = vpop.eup %2765 }
 0x725   : > { %2486 = vmatpush3.bf16.msra.mxu0 %v1530_v17  ;;  %2487 = vmatprep.mubr.msk.bf16.mxu0 %vm3371_vm2, %v3370_v10  ;;  %v2768_v37 = vpop.eup %2767  ;;  %v1365_v39 = vmul.f32 0.0, %v2766_v36 }
 0x726   : > { %2497 = vmatprep.subr.bf16.mxu0 %v3370_v10  ;;  %2503 = vmatprep.subr.bf16.mxu1 %v3370_v10  ;;  %v1364_v41 = vmul.f32 0.0, %v2768_v37  ;;  %v2770_v45 = vpop.eup %2769 }
 0x727   : > { %v1366_v55 = vmul.f32 0.0, %v2770_v45 }
 0x72c   : > { %2488 = vmatmul.mubr.msk.bf16.vlgmr.msra.gmra.mrb[12].mxu0 %vm1142_vm8, %v1386_v19 }
 0x72d   : > { %2499 = vmatprep.mubr.msk.bf16.mxu0 %vm3371_vm2, %v3370_v10  ;;  %2498 = vmatpush3.bf16.msra.mxu0 %v1636_v21 }
 0x72e   : > { %2509 = vmatprep.subr.bf16.mxu0 %v3370_v10 }
 0x7a5   : > { %v1369_v32 = vpop.xlane.xlu0 %1368 }
 0x7a6   : > { %v1379_v35 = vadd.f32 %v1369_v32, %v1363_v33 }
 0x7a8   : > { %2771 = vrcp.f32 %v1379_v35 }
 0x7a9   : > { %v1372_v40 = vpop.xlane.xlu1 %1371 }
 0x7aa   : > { %v1380_v43 = vadd.f32 %v1372_v40, %v1364_v41 }
 0x7ad   : > { %v1375_v38 = vpop.xlane.xlu0 %1374 }
 0x7ae   : > { %v1381_v42 = vadd.f32 %v1375_v38, %v1365_v39  ;;  %v2376_v38 = vld [vmem:[%s751_s16] ss:$0 sm:$0xff]  ;;  %s4573_s16 = smov %s4572_s29 }
 0x7af   : > { %v2740_v7 = vld [vmem:[%s4573_s16 + $0x8] sm:$0xff]  }
 0x7b0   : > { %2773 = vrcp.f32 %v1381_v42 }
 0x7b1   : > { %2775 = vrcp.f32 %v1380_v43  ;;  %v1378_v52 = vpop.xlane.xlu0 %1377 }
 0x7b2   : > { %v2772_v48 = vpop.eup %2771  ;;  %v1382_v51 = vadd.f32 %v1378_v52, %v1366_v55 }
 0x7b4   : > { %2777 = vrcp.f32 %v1382_v51 }
 0x7ba   : > { %v2774_v61 = vpop.eup %2773 }
 0x7bb   : > { %v2776_v5 = vpop.eup %2775 }
 0x7be   : > { %v2778_v17 = vpop.eup %2777 }
 0x7ec   : > { %v1428_v44 = vpop.f32.mrb[12].mxu1 }
 0x7ed   : > { %v1572_v46 = vadd.f32 %v1428_v44, %v1363_v33  ;;  %v2471_v47 = vpop.f32.mrb[13].mxu1 }
 0x7ee   : > { %v1431_v49 = vpop.f32.mrb[14].mxu1 }
 0x7ef   : > { %v1580_v53 = vmul.f32 %v2772_v48, %v1572_v46  ;;  %v2472_v54 = vpop.f32.mrb[15].mxu1 }
 0x7f1   : > { %v1584_v56 = vpack.c.bf16 %v1580_v53, %v1580_v53 }
 0x7f3   : > { %2500 = vmatmul.mubr.msk.bf16.vlgmr.msra.gmra.mrb[16].mxu0 %vm1142_vm8, %v1584_v56 }
 0x7f4   : > { %v1520_v58 = vpop.f32.mrb[16].mxu1  ;;  %2510 = vmatpush3.bf16.msra.mxu0 %v1731_v57  ;;  %2511 = vmatprep.mubr.msk.bf16.mxu0 %vm3371_vm2, %v3370_v10  ;;  %v2377_v57 = vld [vmem:[%s759_s24] ss:$0 sm:$0xff]  ;;  %s2390_s24 = sshll.u32 %s4574_s18, 7 }
 0x7f5   : > { %v1574_v59 = vadd.f32 %v1520_v58, %v1365_v39  ;;  %v2483_v60 = vpop.f32.mrb[17].mxu1  ;;  %2523 = vmatprep.subr.bf16.mxu0 %v3370_v10  ;;  %s4343_s2 = scalar_lea.hbm %s4575_s5, %s2390_s24 }
 0x7f6   : > { %v1523_v62 = vpop.f32.mrb[18].mxu1 }
 0x7f7   : > { %v1474_v63 = vpop.f32.mrb[8].mxu0  ;;  %v1582_v0 = vmul.f32 %v2774_v61, %v1574_v59  ;;  %v2484_v3 = vpop.f32.mrb[19].mxu1 }
 0x7f8   : > { %v1573_v1 = vadd.f32 %v1474_v63, %v1364_v41  ;;  %v2477_v4 = vpop.f32.mrb[9].mxu0 }
 0x7f9   : > { %v1477_v6 = vpop.f32.mrb[10].mxu0  ;;  %v1678_v22 = vpack.c.bf16 %v1582_v0, %v1582_v0 }
 0x7fa   : > { %v1581_v8 = vmul.f32 %v2776_v5, %v1573_v1  ;;  %v2478_v9 = vpop.f32.mrb[11].mxu0  ;;  %v2739_v6 = vld [vmem:[%s4572_s29] sm:$0xff]  }
 0x7fc   : > { %v1585_v11 = vpack.c.bf16 %v1581_v8, %v1581_v8 }
 0x7fe   : > { %2494 = vmatmul.mubr.msk.bf16.vlgmr.msra.gmra.mrb[20].mxu1 %vm1142_vm8, %v1585_v11  ;;  %v1825_v11 = vsub.s32 3, %v4175_v16 }
 0x7ff   : > { %v1566_v13 = vpop.f32.mrb[12].mxu0  ;;  %2504 = vmatpush3.bf16.msra.mxu1 %v1683_v12  ;;  %2505 = vmatprep.mubr.msk.bf16.mxu1 %vm3371_vm2, %v3370_v10  ;;  %v1830_v12 = vsub.s32 4, %v4175_v16 }
 0x800   : > { %v1575_v14 = vadd.f32 %v1566_v13, %v1366_v55  ;;  %v2489_v15 = vpop.f32.mrb[13].mxu0  ;;  %2515 = vmatprep.subr.bf16.mxu1 %v3370_v10  ;;  %v1806_v55 = vsub.s32 2, %v4175_v16  ;;  %v1826_v13 = vrot.slane %v4180_v18, %v1825_v11 }
 0x801   : > { %v1569_v19 = vpop.f32.mrb[14].mxu0 }
 0x802   : > { %v1583_v20 = vmul.f32 %v2778_v17, %v1575_v14  ;;  %v2490_v21 = vpop.f32.mrb[15].mxu0  ;;  %v1807_v59 = vrot.slane %v4180_v18, %v1806_v55  ;;  %v1831_v17 = vrot.slane %v4180_v18, %v1830_v12 }
 0x804   : > { %v1726_v23 = vpack.c.bf16 %v1583_v20, %v1583_v20 }
 0x806   : > { %2506 = vmatmul.mubr.msk.bf16.vlgmr.msra.gmra.mrb[24].mxu1 %vm1142_vm8, %v1678_v22  ;;  %2512 = vmatmul.mubr.msk.bf16.vlgmr.msra.gmra.mrb[20].mxu0 %vm1142_vm8, %v1726_v23  ;;  %v2741_v22 = vld [vmem:[%s4143_s30] sm:$0xff]   ;;  %v2742_v23 = vld [vmem:[%s4143_s30 + $0x8] sm:$0xff]  }
 0x807   : > { %2519 = vmatprep.mubr.msk.bf16.mxu1 %vm3371_vm2, %v3370_v10  ;;  %2531 = vmatprep.mubr.msk.bf16.mxu0 %vm3371_vm2, %v3370_v10 }
 0x808   : > { %2516 = vmatpush3.bf16.msra.mxu1 %v2739_v6  ;;  %2524 = vmatpush3.bf16.msra.mxu0 %v2741_v22 }
 0x809   : > { %2517 = vmatprep.subr.bf16.mxu1 %v3370_v10  ;;  %2525 = vmatprep.subr.bf16.mxu0 %v3370_v10 }
 0x80c   : > { %2518 = vmatpush3.bf16.msra.mxu1 %v2740_v7  ;;  %2526 = vmatpush3.bf16.msra.mxu0 %v2742_v23 }
 0x80d   : > { %2527 = vmatprep.subr.bf16.mxu0 %v3370_v10 }
 0x8c6   : > { %v1672_v24 = vpop.f32.mrb[16].mxu0 }
 0x8c7   : > { %v2501_v25 = vpop.f32.mrb[17].mxu0 }
 0x8c8   : > { %v1675_v26 = vpop.f32.mrb[18].mxu0  ;;  %v2744_v25 = vld [vmem:[%s4143_s30 + $0x18] sm:$0xff]  }
 0x8c9   : > { %v2502_v27 = vpop.f32.mrb[19].mxu0  ;;  %v2378_v26 = vld [vmem:[%s776_s17] ss:$0 sm:$0xff]  ;;  %s1998_s17 = sshll.u32 %s4151_s8, 4  ;;  %s4345_s17 = int_to_ptr.vmem [resolvable:$true] %s1998_s17 }
 0x8ca   : > { %p3186_p2 = scmp.lt.s32.totalorder %s4345_s17, %s3184_s3 }
 0x8d1   : > { %v1626_v28 = vpop.f32.mrb[20].mxu1 }
 0x8d2   : > { %v1673_v29 = vadd.f32 %v1672_v24, %v1626_v28  ;;  %v2495_v30 = vpop.f32.mrb[21].mxu1  ;;  %v2743_v24 = vld [vmem:[%s4143_s30 + $0x10] sm:$0xff]  }
 0x8d3   : > { %v1629_v31 = vpop.f32.mrb[22].mxu1  ;;  %2528 = vmatpush3.bf16.msra.mxu0 %v2743_v24 }
 0x8d4   : > { %v2496_v32 = vpop.f32.mrb[23].mxu1  ;;  %2529 = vmatprep.subr.bf16.mxu0 %v3370_v10 }
 0x8d7   : > { %2530 = vmatpush3.bf16.msra.mxu0 %v2744_v25 }
 0x8d9   : > { %v1719_v33 = vpop.f32.mrb[24].mxu1  ;;  %v1767_v34 = vpop.f32.mrb[20].mxu0 }
 0x8da   : > { %v1725_v35 = vadd.f32 %v1719_v33, %v1673_v29  ;;  %v2507_v36 = vpop.f32.mrb[25].mxu1  ;;  %v2513_v37 = vpop.f32.mrb[21].mxu0 }
 0x8db   : > { %v1722_v39 = vpop.f32.mrb[26].mxu1  ;;  %v1770_v40 = vpop.f32.mrb[22].mxu0  ;;  %v1979_v37 = vsub.s32 5, %v4175_v16 }
 0x8dc   : > { %v1773_v41 = vadd.f32 %v1767_v34, %v1725_v35  ;;  %v2508_v42 = vpop.f32.mrb[27].mxu1  ;;  %v2514_v43 = vpop.f32.mrb[23].mxu0 }
 0x8dd   : > { %v1980_v39 = vrot.slane %v4180_v18, %v1979_v37 }
 0x8de   : > { %v1780_v44 = vadd.f32 %v2376_v38, %v1773_v41  ;;  %v2383_v38 = vld [vmem:[%s793_s28] ss:$0 sm:$0xff]  ;;  %s3179_s28 = scalar_lea.vmem %s4345_s17, 128 }
 0x8df   : > { %p3180_p3 = scmp.ne.s32.totalorder %s4345_s17, %s3179_s28  ;;  %p3187_p10 = scmp.lt.s32.totalorder %s3185_s1, %s3179_s28 }
 0x8e0   : > { %v1781_v45 = vmul.f32 %v1780_v44, %v1780_v44 }
 0x8e1   : > { %p3181_p7 = pnand %p3180_p3, %p4576_p0  ;;  %p3188_p11 = por %p3187_p10, %p3186_p2 }
 0x8e2   : > { %v1782_v46 = vsel %vm927_vm1, %v1781_v45, 0.0 }
 0x8e3   : > { %1783 = vadd.xlane.f32.xlu1 %v1782_v46  ;;  %p3182_p12 = pneg %p3181_p7 }
 0x8e5   : > { %p3189_p1 = pnand %p3188_p11, %p3182_p12 }
 0x970   : > { %v1784_v47 = vpop.xlane.xlu1 %1783 }
 0x971   : > { %2779 = vrsqrt.f32 %v1784_v47  ;;  %vm1787_vm10 = vcmp.eq.f32.partialorder %v1784_v47, inf  ;;  %v1790_v50 = vand.u32 2147483648, %v1784_v47  ;;  %vm1789_vm11 = vcmp.eq.f32.partialorder %v1784_v47, 0.0 }
 0x97b   : > { %v2780_v48 = vpop.eup %2779 }
 0x97c   : > { %v1786_v49 = vmul.f32 %v2780_v48, %v1784_v47 }
 0x97e   : > { %v1788_v52 = vsel %vm1787_vm10, %v1784_v47, %v1786_v49 }
 0x97f   : > { %v1791_v53 = vsel %vm1789_vm11, %v1790_v50, %v1788_v52 }
 0x980   : > { %v1792_v54 = vmax.f32 %v1791_v53, 1e-12 }
 0x982   : > { %2781 = vrcp.f32 %v1792_v54 }
 0x98c   : > { %v2782_v56 = vpop.eup %2781 }
 0x98d   : > { %v1794_v51 = vmul.f32 %v2782_v56, %v1780_v44 }
 0x98f   : > { %v1801_v58 = vmul.f32 %v2377_v57, %v1794_v51 }
 0x991   : > { %v1802_v60 = vmul.f32 5.656854, %v1801_v58 }
 0x993   : > { %v1808_v61 = vmul.f32 %v1807_v59, %v1802_v60 }
 0x995   : > { %v4308_v62 = vadd.f32 %v1808_v61, %v4157_v2 }
 0x997   : > { %v1810_v63 = vsel %vm927_vm1, %v4308_v62, 0.0 }
 0x998   : > { %1811 = vadd.xlane.f32.xlu0 %v1810_v63 }
 0xa25   : > { %v1812_v0 = vpop.xlane.xlu0 %1811 }
 0xa26   : > { %v1813_v1 = vmul.f32 0.03125, %v1812_v0 }
 0xa28   : > { %v1814_v3 = vsub.f32 %v4308_v62, %v1813_v1 }
 0xa2a   : > { %v1815_v4 = vmul.f32 %v1814_v3, %v1814_v3 }
 0xa2c   : > { %v1816_v5 = vsel %vm927_vm1, %v1815_v4, 0.0 }
 0xa2d   : > { %1817 = vadd.xlane.f32.xlu1 %v1816_v5 }
 0xaba   : > { %v1818_v2 = vpop.xlane.xlu1 %1817 }
 0xabb   : > { %v1819_v8 = vmul.f32 0.03125, %v1818_v2 }
 0xabd   : > { %v1820_v9 = vadd.f32 1e-06, %v1819_v8 }
 0xabf   : > { %2783 = vrsqrt.f32 %v1820_v9 }
 0xac9   : > { %v2784_v14 = vpop.eup %2783 }
 0xaca   : > { %v1822_v15 = vmul.f32 %v2784_v14, %v1814_v3 }
 0xacc   : > { %v1827_v19 = vmul.f32 %v1826_v13, %v1822_v15 }
 0xace   : > { %v1832_v20 = vadd.f32 %v1831_v17, %v1827_v19 }
 0xad0   : > { %v1833_v21 = vpack.c.bf16 %v1832_v20, %v1832_v20 }
 0xad2   : > { %2520 = vmatmul.mubr.msk.bf16.vlgmr.msra.gmra.mrb[28].mxu1 %vm927_vm1, %v1833_v21 }
 0xba5   : > { %v1889_v27 = vpop.f32.mrb[28].mxu1 }
 0xba6   : > { %v1890_v28 = vadd.f32 %v2378_v26, %v1889_v27  ;;  %v2521_v29 = vpop.f32.mrb[29].mxu1 }
 0xba7   : > { %v1892_v30 = vpop.f32.mrb[30].mxu1 }
 0xba8   : > { %v2382_v31 = vmul.f32 -1.442695, %v1890_v28  ;;  %v2522_v32 = vpop.f32.mrb[31].mxu1 }
 0xbaa   : > { %2785 = vpow2.f32 %v2382_v31 }
 0xbb4   : > { %v2786_v33 = vpop.eup %2785 }
 0xbb5   : > { %v1898_v34 = vadd.f32 1.0, %v2786_v33 }
 0xbb7   : > { %2787 = vrcp.f32 %v1898_v34 }
 0xbc1   : > { %v2788_v35 = vpop.eup %2787 }
 0xbc2   : > { %v1901_v36 = vmul.f32 %v2788_v35, %v1890_v28 }
 0xbc4   : > { %v1902_v10 = vpack.c.bf16 %v1901_v36, %v1901_v36 }
 0xbc6   : > { %2532 = vmatmul.mubr.msk.bf16.vlgmr.msra.gmra.mrb[24].mxu0 %vm1933_vm12, %v1902_v10 }
 0xc99   : > { %v1971_v40 = vpop.f32.mrb[24].mxu0 }
 0xc9a   : > { %v1972_v41 = vadd.f32 %v2383_v38, %v1971_v40  ;;  %v2533_v42 = vpop.f32.mrb[25].mxu0 }
 0xc9b   : > { %v1974_v43 = vpop.f32.mrb[26].mxu0 }
 0xc9c   : > { %v1981_v44 = vmul.f32 %v1980_v39, %v1972_v41  ;;  %v2534_v45 = vpop.f32.mrb[27].mxu0 }
 0xc9e   : > { %v1982_v46 = vadd.f32 %v1981_v44, %v4308_v62 }
 0xca0   : > { %1983 = vst.msk [vmem:[%s4151_s8] sm:$0xff] %vm927_vm1, %v1982_v46 }
 0xca1   : > { %3192 = shalt.err (!%p3189_p1)
}
 0xca2   : > { %s3193_s4 = scalar_lea.hbm %s4343_s2, 128  ;;  %s3197_s23 = scalar_lea.hbm %s4575_s5, 256 }
 0xca3   : > { %p3194_p8 = scmp.ne.s32.totalorder %s4343_s2, %s3193_s4  ;;  %p3198_p4 = scmp.lt.u32.totalorder %s4343_s2, %s4575_s5 }
 0xca4   : > { %p3199_p9 = scmp.lt.u32.totalorder %s3197_s23, %s3193_s4  ;;  %p3201_p3 = scmp.lt.u32.totalorder %s3193_s4, %s4343_s2 }
 0xca5   : > { %p3195_p6 = pnand %p3194_p8, %p4576_p0 }
 0xca6   : > { %p3200_p5 = por %p3199_p9, %p3198_p4 }
 0xca7   : > { %p3196_p13 = pneg %p3195_p6 }
 0xca8   : > { %p3202_p7 = por %p3201_p3, %p3200_p5 }
 0xcaa   : > { %p3203_p12 = pnand %p3202_p7, %p3196_p13 }
 0xcac   : > { %3206 = shalt.err (!%p3203_p12)
}
 0xcad   : > { %2561 = dma.vmem_to_hbm [thread:$0]  (%p4576_p0), %s4345_s17, 128, %s4343_s2, %s1985_s14  }
 0xcae PF: > { %s4577_s26 = sld [smem:[#allocation40_spill]]  ;;  %s4578_s11 = sld [smem:[#allocation54_spill]] }
 0xcaf   : > { %p2608_p2 = scmp.ge.s32.totalorder %s3353_s21, 2 }
 0xcb4   : > { %s2010_s19 = sand.u32 1, %s4577_s26   ;;  %p4579_p10 = scmp.ne.s32.totalorder %s4578_s11, 0 }
 0xcb5   : > { %s2011_s29 = scalar_lea.sflag [#allocation7], %s2010_s19 }
 0xcb6   : > { %p2604_p11 = pnand %p2608_p2, %p4579_p10 }
 0xcb8   : > { %3296 = dma.done.wait (!%p2604_p11), %s2011_s29, 128  }
 0xcb9   : > { %3298 = vsyncadd (!%p2604_p11), %s2011_s29, 4294967168  ;;  %s47_s21 = sadd.s32 1, %s3353_s21   ;;  %s4581_s25 = sld [smem:[#allocation36_spill]] }
 0xcba   : > { %p4376_p1 = scmp.ge.s32.totalorder %s47_s21, 6   ;;  %s4582_s26 = sld [smem:[#allocation37_spill]] }
 0xcbb   : > { %s4583_s27 = sld [smem:[#allocation49_spill]]  ;;  %s4584_s28 = sld [smem:[#allocation38_spill]] }
 0xcbc   : > { %s4585_s29 = sld [smem:[#allocation39_spill]]  ;;  %s4586_s30 = sld [smem:[#allocation50_spill]] }
 0xcbd   : > { %s4587_s12 = sld [smem:[#allocation41_spill]]  ;;  %s4588_s18 = sld [smem:[#allocation53_spill]] }
 0xcbe   : > { %s4589_s17 = sld [smem:[#allocation44_spill]]  ;;  %s4590_s24 = sld [smem:[#allocation45_spill]] }
 0xcbf   : > { %s4591_s19 = sld [smem:[#allocation46_spill]]  ;;  %s4592_s20 = sld [smem:[#allocation47_spill]] }
 0xcc0   : > { %s4594_s14 = smov %s3329_s15  ;;  %46 = sbr.rel (!%p4376_p1) target bundleno = 37 (0x25), region = 274 }
 0xcc3   : > { %s4595_s15 = smov %s4587_s12  ;;  %s4596_s16 = smov %s4588_s18 }
 0xcc4   : > { %s4597_s18 = smov %s4590_s24 }
 0xcc7   :  { %2016 = vsyncpa [#allocation6], 1 }
 0xcc8   :  { %2018 = vsyncpa [#allocation6 + $0x1], 1 }
 0xcc9   :  { %2019 = vsyncpa [#allocation9], 1 }
 0xcca   :  { %2021 = vsyncpa [#allocation9 + $0x1], 1 }
 0xccb   :  { %2022 = vsyncpa [#allocation12], 1 }
 0xccc   :  { %2024 = vsyncpa [#allocation12 + $0x1], 1 }
 0xccd   :  { %2025 = vsyncpa [#allocation15], 1 }
 0xcce   :  { %2027 = vsyncpa [#allocation15 + $0x1], 1 }
 0xccf   :  { %2028 = vsyncpa [#allocation18], 1 }
 0xcd0   :  { %2030 = vsyncpa [#allocation18 + $0x1], 1 }
 0xcd1   :  { %2031 = vsyncpa [#allocation21], 1 }
 0xcd2   :  { %2033 = vsyncpa [#allocation21 + $0x1], 1 }
 0xcd3   :  { %2034 = vsyncpa [#allocation24], 1 }
 0xcd4   :  { %2036 = vsyncpa [#allocation24 + $0x1], 1 }
 0xcd5   :  { %2037 = vsyncpa [#allocation7], 1 }
 0xcd6   :  { %2039 = vsyncpa [#allocation7 + $0x1], 1 }

</bundles_post_ra>
